<compile_context>
chip_gen: v7x
topology: tpu7x:2x2x1
jax: 0.10.0
libtpu: 0.0.40
codegen_flags: <defaults>
</compile_context>

<pallas_src>
import math

import jax
import jax.numpy as jnp
from jax.experimental import pallas as pl
from jax.experimental.pallas import tpu as pltpu


# ----------------------------------------------------------------------------
# Fused forward kernel (built per static layer configuration).
# ----------------------------------------------------------------------------
def _make_fused_kernel(seq_len, cfgs, n_enc):
    n_layers = len(cfgs)

    def kernel(*refs):
        x_ref = refs[0]
        layer_refs = refs[1:1 + 3 * n_layers]          # (wih4, whh4, b4) per layer
        dense_ref = refs[1 + 3 * n_layers]
        out_ref = refs[2 + 3 * n_layers]
        scratch = refs[3 + 3 * n_layers:]              # 5 scratch refs per layer

        def run_layer(x_in, wih_ref, whh_ref, b_ref, xw_scrs, y_scr, cfg):
            H = cfg["hidden"]
            const_input = cfg["const_input"]
            sigmoid_out = cfg["sigmoid_out"]
            need_seq = cfg["need_seq"]

            # Per-gate recurrent weights / biases, loaded once (loop invariant).
            whh = [whh_ref[k] for k in range(4)]        # each (H, H)
            bias = [b_ref[k] for k in range(4)]         # each (1, H)

            if const_input:
                # Input identical at every timestep -> project it once.
                xw_const = [
                    jnp.dot(x_in, wih_ref[k], preferred_element_type=jnp.float32)
                    + bias[k]
                    for k in range(4)]                  # each (1, H)
            else:
                # Hoisted input projection for all T steps: (T, I) @ (I, H).
                for k in range(4):
                    xw_scrs[k][...] = (
                        jnp.dot(x_in, wih_ref[k],
                                preferred_element_type=jnp.float32)
                        + bias[k])
                xw_const = None

            def step(t, carry):
                h, c = carry
                gates = []
                for k in range(4):
                    rec = jnp.dot(h, whh[k], preferred_element_type=jnp.float32)
                    if const_input:
                        gates.append(xw_const[k] + rec)
                    else:
                        gates.append(xw_scrs[k][pl.ds(t, 1), :] + rec)
                i_g = jax.nn.sigmoid(gates[0])
                f_g = jax.nn.sigmoid(gates[1])
                g_g = jnp.tanh(gates[2])
                o_g = jax.nn.sigmoid(gates[3])
                c_new = f_g * c + i_g * g_g
                h_new = o_g * jnp.tanh(c_new)
                if need_seq:
                    # h_activ (sigmoid) applies only to the sequence handed to
                    # the next layer, not to the recurrent state.
                    y_scr[pl.ds(t, 1), :] = (jax.nn.sigmoid(h_new)
                                             if sigmoid_out else h_new)
                return (h_new, c_new)

            h0 = jnp.zeros((1, H), dtype=jnp.float32)
            c0 = jnp.zeros((1, H), dtype=jnp.float32)
            h_n, _ = jax.lax.fori_loop(0, seq_len, step, (h0, c0))
            return h_n

        cur = x_ref[...]                                # (T, I0)
        for li, cfg in enumerate(cfgs):
            wih_ref = layer_refs[3 * li]
            whh_ref = layer_refs[3 * li + 1]
            b_ref = layer_refs[3 * li + 2]
            xw_scrs = scratch[5 * li: 5 * li + 4]
            y_scr = scratch[5 * li + 4]

            h_n = run_layer(cur, wih_ref, whh_ref, b_ref, xw_scrs, y_scr, cfg)

            if li == n_enc - 1:
                # End of encoder: z = tanh(h_n) becomes the (time-constant)
                # decoder input (PyTorch: out_activ(h_n) then repeat(seq_len,1)).
                cur = jnp.tanh(h_n)                     # (1, enc_dim)
            else:
                cur = y_scr[...]                        # (T, H) feeds next layer

        # Fused final dense projection: (T, H_last) @ (H_last, input_dim).
        out_ref[...] = jnp.dot(cur, dense_ref[...],
                               preferred_element_type=jnp.float32)

    return kernel


# ----------------------------------------------------------------------------
# Forward wrapper: one pallas_call for the whole model.
# ----------------------------------------------------------------------------
def lstm_ae_forward(params, x):
    T, input_dim = x.shape
    enc = params["encoder"]
    dec = params["decoder"]
    layers = list(enc) + list(dec)
    n_enc, n_dec = len(enc), len(dec)

    cfgs = []
    for i, p in enumerate(enc):
        cfgs.append(dict(hidden=int(p["whh4"].shape[-1]),
                         const_input=False,
                         sigmoid_out=(i < n_enc - 1),
                         need_seq=(i < n_enc - 1)))
    for i, p in enumerate(dec):
        cfgs.append(dict(hidden=int(p["whh4"].shape[-1]),
                         const_input=(i == 0),
                         sigmoid_out=(i < n_dec - 1),
                         need_seq=True))

    flat_inputs = [x]
    for p in layers:
        flat_inputs += [p["wih4"], p["whh4"], p["b4"]]
    flat_inputs.append(params["dense"])

    # Per layer: 4 hoisted-xW buffers (one per gate) + 1 output-sequence buffer.
    scratch_shapes = []
    for cfg in cfgs:
        H = cfg["hidden"]
        scratch_shapes += [pltpu.VMEM((T, H), jnp.float32) for _ in range(5)]

    kernel = _make_fused_kernel(T, cfgs, n_enc)
    vmem_spec = pl.BlockSpec(memory_space=pltpu.MemorySpace.VMEM)

    return pl.pallas_call(
        kernel,
        out_shape=jax.ShapeDtypeStruct((T, input_dim), jnp.float32),
        in_specs=[vmem_spec] * len(flat_inputs),
        out_specs=vmem_spec,
        scratch_shapes=tuple(scratch_shapes),
    )(*flat_inputs)


# ----------------------------------------------------------------------------
# Parameter init (mirrors torch.nn.LSTM defaults; weights pre-split per gate).
# ----------------------------------------------------------------------------
def init_lstm_params(key, input_size, hidden_size):
    k = 1.0 / math.sqrt(hidden_size)
    k1, k2, k3, k4 = jax.random.split(key, 4)
    w_ih = jax.random.uniform(k1, (4 * hidden_size, input_size),
                              minval=-k, maxval=k, dtype=jnp.float32)
    w_hh = jax.random.uniform(k2, (4 * hidden_size, hidden_size),
                              minval=-k, maxval=k, dtype=jnp.float32)
    b_ih = jax.random.uniform(k3, (4 * hidden_size,),
                              minval=-k, maxval=k, dtype=jnp.float32)
    b_hh = jax.random.uniform(k4, (4 * hidden_size,),
                              minval=-k, maxval=k, dtype=jnp.float32)
    H = hidden_size
    return {
        # gate order [i, f, g, o], pre-transposed per gate
        "wih4": w_ih.reshape(4, H, input_size).transpose(0, 2, 1),   # (4, I, H)
        "whh4": w_hh.reshape(4, H, H).transpose(0, 2, 1),            # (4, H, H)
        "b4": (b_ih + b_hh).reshape(4, 1, H),                        # (4, 1, H)
    }


def init_lstm_ae_params(key, input_dim, encoding_dim, h_dims):
    enc_dims = [input_dim] + h_dims + [encoding_dim]
    dec_h = h_dims[::-1]
    dec_dims = [encoding_dim] + dec_h + [dec_h[-1]]

    n_keys = (len(enc_dims) - 1) + (len(dec_dims) - 1) + 1
    keys = jax.random.split(key, n_keys)
    ki = 0

    encoder = []
    for i in range(len(enc_dims) - 1):
        encoder.append(init_lstm_params(keys[ki], enc_dims[i], enc_dims[i + 1]))
        ki += 1
    decoder = []
    for i in range(len(dec_dims) - 1):
        decoder.append(init_lstm_params(keys[ki], dec_dims[i], dec_dims[i + 1]))
        ki += 1
    # torch.rand -> uniform [0, 1)
    dense = jax.random.uniform(keys[ki], (dec_dims[-1], input_dim),
                               dtype=jnp.float32)
    return {"encoder": encoder, "decoder": decoder, "dense": dense}


# ----------------------------------------------------------------------------
# Pure-JAX reference (for correctness check only).
# ----------------------------------------------------------------------------
def _lstm_ae_reference(params, x):
    T = x.shape[0]
    hp = jax.lax.Precision.HIGHEST

    def run_layer(seq, p, sigmoid_out):
        H = p["whh4"].shape[-1]
        h = jnp.zeros((1, H), jnp.float32)
        c = jnp.zeros((1, H), jnp.float32)
        ys = []
        for t in range(T):
            x_t = seq[t:t + 1]
            g = [jnp.dot(x_t, p["wih4"][k], precision=hp)
                 + jnp.dot(h, p["whh4"][k], precision=hp) + p["b4"][k]
                 for k in range(4)]
            i_g = jax.nn.sigmoid(g[0])
            f_g = jax.nn.sigmoid(g[1])
            g_g = jnp.tanh(g[2])
            o_g = jax.nn.sigmoid(g[3])
            c = f_g * c + i_g * g_g
            h = o_g * jnp.tanh(c)
            ys.append(jax.nn.sigmoid(h) if sigmoid_out else h)
        return jnp.concatenate(ys, axis=0), h

    enc, dec = params["encoder"], params["decoder"]
    n_enc, n_dec = len(enc), len(dec)
    seq, h_n = x, None
    for i, p in enumerate(enc):
        seq, h_n = run_layer(seq, p, i < n_enc - 1)
    z = jnp.tanh(h_n)
    seq = jnp.tile(z, (T, 1))
    for i, p in enumerate(dec):
        seq, _ = run_layer(seq, p, i < n_dec - 1)
    return jnp.dot(seq, params["dense"], precision=hp)


# TODO(synk): train_model (Adam/StepLR/MSE training loop, checkpointing) is
# host-side training logic, not part of the forward pass; not translated.


if __name__ == "__main__":
    input_dim, encoding_dim, h_dims, seq_len = 16, 8, [32], 8

    root = jax.random.PRNGKey(0)
    k_params, k_data = jax.random.split(root)

    params = init_lstm_ae_params(k_params, input_dim, encoding_dim, h_dims)
    x = jax.random.normal(k_data, (seq_len, input_dim), dtype=jnp.float32)

    fwd = jax.jit(lstm_ae_forward)
    out = jax.block_until_ready(fwd(params, x))

    assert out.shape == (seq_len, input_dim), out.shape
    assert out.dtype == jnp.float32
    assert bool(jnp.all(jnp.isfinite(out)))

    ref = _lstm_ae_reference(params, x)
    max_err = float(jnp.max(jnp.abs(out - ref)))
    assert bool(jnp.allclose(out, ref, atol=2e-3, rtol=2e-3)), max_err

    print("KERNEL_OK")
</pallas_src>

<mosaic_0001>
module attributes {stable_mosaic.version = 11 : i64} {
  func.func @kernel(%arg0: memref<8x16xf32, #tpu.memory_space<vmem>>, %arg1: memref<4x16x32xf32, #tpu.memory_space<vmem>>, %arg2: memref<4x32x32xf32, #tpu.memory_space<vmem>>, %arg3: memref<4x1x32xf32, #tpu.memory_space<vmem>>, %arg4: memref<4x32x8xf32, #tpu.memory_space<vmem>>, %arg5: memref<4x8x8xf32, #tpu.memory_space<vmem>>, %arg6: memref<4x1x8xf32, #tpu.memory_space<vmem>>, %arg7: memref<4x8x32xf32, #tpu.memory_space<vmem>>, %arg8: memref<4x32x32xf32, #tpu.memory_space<vmem>>, %arg9: memref<4x1x32xf32, #tpu.memory_space<vmem>>, %arg10: memref<4x32x32xf32, #tpu.memory_space<vmem>>, %arg11: memref<4x32x32xf32, #tpu.memory_space<vmem>>, %arg12: memref<4x1x32xf32, #tpu.memory_space<vmem>>, %arg13: memref<32x16xf32, #tpu.memory_space<vmem>>, %arg14: memref<8x16xf32, #tpu.memory_space<vmem>>, %arg15: memref<8x32xf32, #tpu.memory_space<vmem>>, %arg16: memref<8x32xf32, #tpu.memory_space<vmem>>, %arg17: memref<8x32xf32, #tpu.memory_space<vmem>>, %arg18: memref<8x32xf32, #tpu.memory_space<vmem>>, %arg19: memref<8x32xf32, #tpu.memory_space<vmem>>, %arg20: memref<8x8xf32, #tpu.memory_space<vmem>>, %arg21: memref<8x8xf32, #tpu.memory_space<vmem>>, %arg22: memref<8x8xf32, #tpu.memory_space<vmem>>, %arg23: memref<8x8xf32, #tpu.memory_space<vmem>>, %arg24: memref<8x8xf32, #tpu.memory_space<vmem>>, %arg25: memref<8x32xf32, #tpu.memory_space<vmem>>, %arg26: memref<8x32xf32, #tpu.memory_space<vmem>>, %arg27: memref<8x32xf32, #tpu.memory_space<vmem>>, %arg28: memref<8x32xf32, #tpu.memory_space<vmem>>, %arg29: memref<8x32xf32, #tpu.memory_space<vmem>>, %arg30: memref<8x32xf32, #tpu.memory_space<vmem>>, %arg31: memref<8x32xf32, #tpu.memory_space<vmem>>, %arg32: memref<8x32xf32, #tpu.memory_space<vmem>>, %arg33: memref<8x32xf32, #tpu.memory_space<vmem>>, %arg34: memref<8x32xf32, #tpu.memory_space<vmem>>) attributes {dimension_semantics = [], scalar_prefetch = 0 : i64, scratch_operands = 20 : i64, tpu.core_type = #tpu.core_type<tc>} {
    %c0 = arith.constant 0 : index
    %c0_0 = arith.constant 0 : index
    %0 = vector.load %arg0[%c0, %c0_0] : memref<8x16xf32, #tpu.memory_space<vmem>>, vector<8x16xf32>
    %c0_1 = arith.constant 0 : index
    %c0_2 = arith.constant 0 : index
    %c0_3 = arith.constant 0 : index
    %1 = vector.load %arg2[%c0_1, %c0_2, %c0_3] : memref<4x32x32xf32, #tpu.memory_space<vmem>>, vector<1x32x32xf32>
    %2 = vector.shape_cast %1 : vector<1x32x32xf32> to vector<32x32xf32>
    %c1 = arith.constant 1 : index
    %c0_4 = arith.constant 0 : index
    %c0_5 = arith.constant 0 : index
    %3 = vector.load %arg2[%c1, %c0_4, %c0_5] : memref<4x32x32xf32, #tpu.memory_space<vmem>>, vector<1x32x32xf32>
    %4 = vector.shape_cast %3 : vector<1x32x32xf32> to vector<32x32xf32>
    %c2 = arith.constant 2 : index
    %c0_6 = arith.constant 0 : index
    %c0_7 = arith.constant 0 : index
    %5 = vector.load %arg2[%c2, %c0_6, %c0_7] : memref<4x32x32xf32, #tpu.memory_space<vmem>>, vector<1x32x32xf32>
    %6 = vector.shape_cast %5 : vector<1x32x32xf32> to vector<32x32xf32>
    %c3 = arith.constant 3 : index
    %c0_8 = arith.constant 0 : index
    %c0_9 = arith.constant 0 : index
    %7 = vector.load %arg2[%c3, %c0_8, %c0_9] : memref<4x32x32xf32, #tpu.memory_space<vmem>>, vector<1x32x32xf32>
    %8 = vector.shape_cast %7 : vector<1x32x32xf32> to vector<32x32xf32>
    %c0_10 = arith.constant 0 : index
    %c0_11 = arith.constant 0 : index
    %c0_12 = arith.constant 0 : index
    %9 = vector.load %arg3[%c0_10, %c0_11, %c0_12] : memref<4x1x32xf32, #tpu.memory_space<vmem>>, vector<1x1x32xf32>
    %10 = vector.shape_cast %9 : vector<1x1x32xf32> to vector<1x32xf32>
    %c1_13 = arith.constant 1 : index
    %c0_14 = arith.constant 0 : index
    %c0_15 = arith.constant 0 : index
    %11 = vector.load %arg3[%c1_13, %c0_14, %c0_15] : memref<4x1x32xf32, #tpu.memory_space<vmem>>, vector<1x1x32xf32>
    %12 = vector.shape_cast %11 : vector<1x1x32xf32> to vector<1x32xf32>
    %c2_16 = arith.constant 2 : index
    %c0_17 = arith.constant 0 : index
    %c0_18 = arith.constant 0 : index
    %13 = vector.load %arg3[%c2_16, %c0_17, %c0_18] : memref<4x1x32xf32, #tpu.memory_space<vmem>>, vector<1x1x32xf32>
    %14 = vector.shape_cast %13 : vector<1x1x32xf32> to vector<1x32xf32>
    %c3_19 = arith.constant 3 : index
    %c0_20 = arith.constant 0 : index
    %c0_21 = arith.constant 0 : index
    %15 = vector.load %arg3[%c3_19, %c0_20, %c0_21] : memref<4x1x32xf32, #tpu.memory_space<vmem>>, vector<1x1x32xf32>
    %16 = vector.shape_cast %15 : vector<1x1x32xf32> to vector<1x32xf32>
    %c0_22 = arith.constant 0 : index
    %c0_23 = arith.constant 0 : index
    %c0_24 = arith.constant 0 : index
    %17 = vector.load %arg1[%c0_22, %c0_23, %c0_24] : memref<4x16x32xf32, #tpu.memory_space<vmem>>, vector<1x16x32xf32>
    %18 = vector.shape_cast %17 : vector<1x16x32xf32> to vector<16x32xf32>
    %cst = arith.constant dense<0.000000e+00> : vector<8x32xf32>
    %19 = tpu.matmul %0, %18, %cst {dimension_numbers = #tpu.dot_dimension_numbers<[1], [0], [0], [1], [0, 0, 1, 1], [], []>} : vector<8x16xf32>, vector<16x32xf32>, vector<8x32xf32> -> vector<8x32xf32>
    %20 = vector.broadcast %10 : vector<1x32xf32> to vector<8x32xf32>
    %21 = arith.addf %19, %20 : vector<8x32xf32>
    %c0_25 = arith.constant 0 : index
    %c0_26 = arith.constant 0 : index
    %22 = vector.load %arg15[%c0_25, %c0_26] : memref<8x32xf32, #tpu.memory_space<vmem>>, vector<8x32xf32>
    tpu.vector_store %arg15[%c0_25, %c0_26], %21 {strides = array<i32>} : memref<8x32xf32, #tpu.memory_space<vmem>>, vector<8x32xf32>,
    %c1_27 = arith.constant 1 : index
    %c0_28 = arith.constant 0 : index
    %c0_29 = arith.constant 0 : index
    %23 = vector.load %arg1[%c1_27, %c0_28, %c0_29] : memref<4x16x32xf32, #tpu.memory_space<vmem>>, vector<1x16x32xf32>
    %24 = vector.shape_cast %23 : vector<1x16x32xf32> to vector<16x32xf32>
    %cst_30 = arith.constant dense<0.000000e+00> : vector<8x32xf32>
    %25 = tpu.matmul %0, %24, %cst_30 {dimension_numbers = #tpu.dot_dimension_numbers<[1], [0], [0], [1], [0, 0, 1, 1], [], []>} : vector<8x16xf32>, vector<16x32xf32>, vector<8x32xf32> -> vector<8x32xf32>
    %26 = vector.broadcast %12 : vector<1x32xf32> to vector<8x32xf32>
    %27 = arith.addf %25, %26 : vector<8x32xf32>
    %c0_31 = arith.constant 0 : index
    %c0_32 = arith.constant 0 : index
    %28 = vector.load %arg16[%c0_31, %c0_32] : memref<8x32xf32, #tpu.memory_space<vmem>>, vector<8x32xf32>
    tpu.vector_store %arg16[%c0_31, %c0_32], %27 {strides = array<i32>} : memref<8x32xf32, #tpu.memory_space<vmem>>, vector<8x32xf32>,
    %c2_33 = arith.constant 2 : index
    %c0_34 = arith.constant 0 : index
    %c0_35 = arith.constant 0 : index
    %29 = vector.load %arg1[%c2_33, %c0_34, %c0_35] : memref<4x16x32xf32, #tpu.memory_space<vmem>>, vector<1x16x32xf32>
    %30 = vector.shape_cast %29 : vector<1x16x32xf32> to vector<16x32xf32>
    %cst_36 = arith.constant dense<0.000000e+00> : vector<8x32xf32>
    %31 = tpu.matmul %0, %30, %cst_36 {dimension_numbers = #tpu.dot_dimension_numbers<[1], [0], [0], [1], [0, 0, 1, 1], [], []>} : vector<8x16xf32>, vector<16x32xf32>, vector<8x32xf32> -> vector<8x32xf32>
    %32 = vector.broadcast %14 : vector<1x32xf32> to vector<8x32xf32>
    %33 = arith.addf %31, %32 : vector<8x32xf32>
    %c0_37 = arith.constant 0 : index
    %c0_38 = arith.constant 0 : index
    %34 = vector.load %arg17[%c0_37, %c0_38] : memref<8x32xf32, #tpu.memory_space<vmem>>, vector<8x32xf32>
    tpu.vector_store %arg17[%c0_37, %c0_38], %33 {strides = array<i32>} : memref<8x32xf32, #tpu.memory_space<vmem>>, vector<8x32xf32>,
    %c3_39 = arith.constant 3 : index
    %c0_40 = arith.constant 0 : index
    %c0_41 = arith.constant 0 : index
    %35 = vector.load %arg1[%c3_39, %c0_40, %c0_41] : memref<4x16x32xf32, #tpu.memory_space<vmem>>, vector<1x16x32xf32>
    %36 = vector.shape_cast %35 : vector<1x16x32xf32> to vector<16x32xf32>
    %cst_42 = arith.constant dense<0.000000e+00> : vector<8x32xf32>
    %37 = tpu.matmul %0, %36, %cst_42 {dimension_numbers = #tpu.dot_dimension_numbers<[1], [0], [0], [1], [0, 0, 1, 1], [], []>} : vector<8x16xf32>, vector<16x32xf32>, vector<8x32xf32> -> vector<8x32xf32>
    %38 = vector.broadcast %16 : vector<1x32xf32> to vector<8x32xf32>
    %39 = arith.addf %37, %38 : vector<8x32xf32>
    %c0_43 = arith.constant 0 : index
    %c0_44 = arith.constant 0 : index
    %40 = vector.load %arg18[%c0_43, %c0_44] : memref<8x32xf32, #tpu.memory_space<vmem>>, vector<8x32xf32>
    tpu.vector_store %arg18[%c0_43, %c0_44], %39 {strides = array<i32>} : memref<8x32xf32, #tpu.memory_space<vmem>>, vector<8x32xf32>,
    %cst_45 = arith.constant 0.000000e+00 : f32
    %41 = vector.broadcast %cst_45 : f32 to vector<1x32xf32>
    %cst_46 = arith.constant 0.000000e+00 : f32
    %42 = vector.broadcast %cst_46 : f32 to vector<1x32xf32>
    %c0_i32 = arith.constant 0 : i32
    %c8_i32 = arith.constant 8 : i32
    %43 = arith.addi %c0_i32, %c8_i32 : i32
    %c1_i32 = arith.constant 1 : i32
    %44:2 = scf.for %arg35 = %c0_i32 to %43 step %c1_i32 iter_args(%arg36 = %41, %arg37 = %42) -> (vector<1x32xf32>, vector<1x32xf32>)  : i32 {
      %cst_213 = arith.constant dense<0.000000e+00> : vector<1x32xf32>
      %176 = tpu.matmul %arg36, %2, %cst_213 {dimension_numbers = #tpu.dot_dimension_numbers<[1], [0], [0], [1], [0, 0, 1, 1], [], []>} : vector<1x32xf32>, vector<32x32xf32>, vector<1x32xf32> -> vector<1x32xf32>
      %177 = arith.index_cast %arg35 : i32 to index
      %c0_214 = arith.constant 0 : index
      %178 = vector.load %arg15[%177, %c0_214] : memref<8x32xf32, #tpu.memory_space<vmem>>, vector<1x32xf32>
      %179 = arith.addf %178, %176 : vector<1x32xf32>
      %cst_215 = arith.constant dense<0.000000e+00> : vector<1x32xf32>
      %180 = tpu.matmul %arg36, %4, %cst_215 {dimension_numbers = #tpu.dot_dimension_numbers<[1], [0], [0], [1], [0, 0, 1, 1], [], []>} : vector<1x32xf32>, vector<32x32xf32>, vector<1x32xf32> -> vector<1x32xf32>
      %181 = arith.index_cast %arg35 : i32 to index
      %c0_216 = arith.constant 0 : index
      %182 = vector.load %arg16[%181, %c0_216] : memref<8x32xf32, #tpu.memory_space<vmem>>, vector<1x32xf32>
      %183 = arith.addf %182, %180 : vector<1x32xf32>
      %cst_217 = arith.constant dense<0.000000e+00> : vector<1x32xf32>
      %184 = tpu.matmul %arg36, %6, %cst_217 {dimension_numbers = #tpu.dot_dimension_numbers<[1], [0], [0], [1], [0, 0, 1, 1], [], []>} : vector<1x32xf32>, vector<32x32xf32>, vector<1x32xf32> -> vector<1x32xf32>
      %185 = arith.index_cast %arg35 : i32 to index
      %c0_218 = arith.constant 0 : index
      %186 = vector.load %arg17[%185, %c0_218] : memref<8x32xf32, #tpu.memory_space<vmem>>, vector<1x32xf32>
      %187 = arith.addf %186, %184 : vector<1x32xf32>
      %cst_219 = arith.constant dense<0.000000e+00> : vector<1x32xf32>
      %188 = tpu.matmul %arg36, %8, %cst_219 {dimension_numbers = #tpu.dot_dimension_numbers<[1], [0], [0], [1], [0, 0, 1, 1], [], []>} : vector<1x32xf32>, vector<32x32xf32>, vector<1x32xf32> -> vector<1x32xf32>
      %189 = arith.index_cast %arg35 : i32 to index
      %c0_220 = arith.constant 0 : index
      %190 = vector.load %arg18[%189, %c0_220] : memref<8x32xf32, #tpu.memory_space<vmem>>, vector<1x32xf32>
      %191 = arith.addf %190, %188 : vector<1x32xf32>
      %192 = arith.negf %179 : vector<1x32xf32>
      %193 = math.exp %192 : vector<1x32xf32>
      %cst_221 = arith.constant 1.000000e+00 : f32
      %194 = vector.broadcast %cst_221 : f32 to vector<1x32xf32>
      %195 = arith.addf %194, %193 : vector<1x32xf32>
      %196 = arith.divf %194, %195 : vector<1x32xf32>
      %197 = arith.negf %183 : vector<1x32xf32>
      %198 = math.exp %197 : vector<1x32xf32>
      %cst_222 = arith.constant 1.000000e+00 : f32
      %199 = vector.broadcast %cst_222 : f32 to vector<1x32xf32>
      %200 = arith.addf %199, %198 : vector<1x32xf32>
      %201 = arith.divf %199, %200 : vector<1x32xf32>
      %202 = math.tanh %187 : vector<1x32xf32>
      %203 = arith.negf %191 : vector<1x32xf32>
      %204 = math.exp %203 : vector<1x32xf32>
      %cst_223 = arith.constant 1.000000e+00 : f32
      %205 = vector.broadcast %cst_223 : f32 to vector<1x32xf32>
      %206 = arith.addf %205, %204 : vector<1x32xf32>
      %207 = arith.divf %205, %206 : vector<1x32xf32>
      %208 = arith.mulf %201, %arg37 : vector<1x32xf32>
      %209 = arith.mulf %196, %202 : vector<1x32xf32>
      %210 = arith.addf %208, %209 : vector<1x32xf32>
      %211 = math.tanh %210 : vector<1x32xf32>
      %212 = arith.mulf %207, %211 : vector<1x32xf32>
      %213 = arith.negf %212 : vector<1x32xf32>
      %214 = math.exp %213 : vector<1x32xf32>
      %cst_224 = arith.constant 1.000000e+00 : f32
      %215 = vector.broadcast %cst_224 : f32 to vector<1x32xf32>
      %216 = arith.addf %215, %214 : vector<1x32xf32>
      %217 = arith.divf %215, %216 : vector<1x32xf32>
      %218 = arith.index_cast %arg35 : i32 to index
      %c0_225 = arith.constant 0 : index
      %219 = vector.load %arg19[%218, %c0_225] : memref<8x32xf32, #tpu.memory_space<vmem>>, vector<1x32xf32>
      tpu.vector_store %arg19[%218, %c0_225], %217 {strides = array<i32>} : memref<8x32xf32, #tpu.memory_space<vmem>>, vector<1x32xf32>,
      scf.yield %212, %210 : vector<1x32xf32>, vector<1x32xf32>
    }
    %c8_i32_47 = arith.constant 8 : i32
    %c0_48 = arith.constant 0 : index
    %c0_49 = arith.constant 0 : index
    %45 = vector.load %arg19[%c0_48, %c0_49] : memref<8x32xf32, #tpu.memory_space<vmem>>, vector<8x32xf32>
    %c0_50 = arith.constant 0 : index
    %c0_51 = arith.constant 0 : index
    %c0_52 = arith.constant 0 : index
    %46 = vector.load %arg5[%c0_50, %c0_51, %c0_52] : memref<4x8x8xf32, #tpu.memory_space<vmem>>, vector<1x8x8xf32>
    %47 = vector.shape_cast %46 : vector<1x8x8xf32> to vector<8x8xf32>
    %c1_53 = arith.constant 1 : index
    %c0_54 = arith.constant 0 : index
    %c0_55 = arith.constant 0 : index
    %48 = vector.load %arg5[%c1_53, %c0_54, %c0_55] : memref<4x8x8xf32, #tpu.memory_space<vmem>>, vector<1x8x8xf32>
    %49 = vector.shape_cast %48 : vector<1x8x8xf32> to vector<8x8xf32>
    %c2_56 = arith.constant 2 : index
    %c0_57 = arith.constant 0 : index
    %c0_58 = arith.constant 0 : index
    %50 = vector.load %arg5[%c2_56, %c0_57, %c0_58] : memref<4x8x8xf32, #tpu.memory_space<vmem>>, vector<1x8x8xf32>
    %51 = vector.shape_cast %50 : vector<1x8x8xf32> to vector<8x8xf32>
    %c3_59 = arith.constant 3 : index
    %c0_60 = arith.constant 0 : index
    %c0_61 = arith.constant 0 : index
    %52 = vector.load %arg5[%c3_59, %c0_60, %c0_61] : memref<4x8x8xf32, #tpu.memory_space<vmem>>, vector<1x8x8xf32>
    %53 = vector.shape_cast %52 : vector<1x8x8xf32> to vector<8x8xf32>
    %c0_62 = arith.constant 0 : index
    %c0_63 = arith.constant 0 : index
    %c0_64 = arith.constant 0 : index
    %54 = vector.load %arg6[%c0_62, %c0_63, %c0_64] : memref<4x1x8xf32, #tpu.memory_space<vmem>>, vector<1x1x8xf32>
    %55 = vector.shape_cast %54 : vector<1x1x8xf32> to vector<1x8xf32>
    %c1_65 = arith.constant 1 : index
    %c0_66 = arith.constant 0 : index
    %c0_67 = arith.constant 0 : index
    %56 = vector.load %arg6[%c1_65, %c0_66, %c0_67] : memref<4x1x8xf32, #tpu.memory_space<vmem>>, vector<1x1x8xf32>
    %57 = vector.shape_cast %56 : vector<1x1x8xf32> to vector<1x8xf32>
    %c2_68 = arith.constant 2 : index
    %c0_69 = arith.constant 0 : index
    %c0_70 = arith.constant 0 : index
    %58 = vector.load %arg6[%c2_68, %c0_69, %c0_70] : memref<4x1x8xf32, #tpu.memory_space<vmem>>, vector<1x1x8xf32>
    %59 = vector.shape_cast %58 : vector<1x1x8xf32> to vector<1x8xf32>
    %c3_71 = arith.constant 3 : index
    %c0_72 = arith.constant 0 : index
    %c0_73 = arith.constant 0 : index
    %60 = vector.load %arg6[%c3_71, %c0_72, %c0_73] : memref<4x1x8xf32, #tpu.memory_space<vmem>>, vector<1x1x8xf32>
    %61 = vector.shape_cast %60 : vector<1x1x8xf32> to vector<1x8xf32>
    %c0_74 = arith.constant 0 : index
    %c0_75 = arith.constant 0 : index
    %c0_76 = arith.constant 0 : index
    %62 = vector.load %arg4[%c0_74, %c0_75, %c0_76] : memref<4x32x8xf32, #tpu.memory_space<vmem>>, vector<1x32x8xf32>
    %63 = vector.shape_cast %62 : vector<1x32x8xf32> to vector<32x8xf32>
    %cst_77 = arith.constant dense<0.000000e+00> : vector<8x8xf32>
    %64 = tpu.matmul %45, %63, %cst_77 {dimension_numbers = #tpu.dot_dimension_numbers<[1], [0], [0], [1], [0, 0, 1, 1], [], []>} : vector<8x32xf32>, vector<32x8xf32>, vector<8x8xf32> -> vector<8x8xf32>
    %65 = vector.broadcast %55 : vector<1x8xf32> to vector<8x8xf32>
    %66 = arith.addf %64, %65 : vector<8x8xf32>
    %c0_78 = arith.constant 0 : index
    %c0_79 = arith.constant 0 : index
    %67 = vector.load %arg20[%c0_78, %c0_79] : memref<8x8xf32, #tpu.memory_space<vmem>>, vector<8x8xf32>
    tpu.vector_store %arg20[%c0_78, %c0_79], %66 {strides = array<i32>} : memref<8x8xf32, #tpu.memory_space<vmem>>, vector<8x8xf32>,
    %c1_80 = arith.constant 1 : index
    %c0_81 = arith.constant 0 : index
    %c0_82 = arith.constant 0 : index
    %68 = vector.load %arg4[%c1_80, %c0_81, %c0_82] : memref<4x32x8xf32, #tpu.memory_space<vmem>>, vector<1x32x8xf32>
    %69 = vector.shape_cast %68 : vector<1x32x8xf32> to vector<32x8xf32>
    %cst_83 = arith.constant dense<0.000000e+00> : vector<8x8xf32>
    %70 = tpu.matmul %45, %69, %cst_83 {dimension_numbers = #tpu.dot_dimension_numbers<[1], [0], [0], [1], [0, 0, 1, 1], [], []>} : vector<8x32xf32>, vector<32x8xf32>, vector<8x8xf32> -> vector<8x8xf32>
    %71 = vector.broadcast %57 : vector<1x8xf32> to vector<8x8xf32>
    %72 = arith.addf %70, %71 : vector<8x8xf32>
    %c0_84 = arith.constant 0 : index
    %c0_85 = arith.constant 0 : index
    %73 = vector.load %arg21[%c0_84, %c0_85] : memref<8x8xf32, #tpu.memory_space<vmem>>, vector<8x8xf32>
    tpu.vector_store %arg21[%c0_84, %c0_85], %72 {strides = array<i32>} : memref<8x8xf32, #tpu.memory_space<vmem>>, vector<8x8xf32>,
    %c2_86 = arith.constant 2 : index
    %c0_87 = arith.constant 0 : index
    %c0_88 = arith.constant 0 : index
    %74 = vector.load %arg4[%c2_86, %c0_87, %c0_88] : memref<4x32x8xf32, #tpu.memory_space<vmem>>, vector<1x32x8xf32>
    %75 = vector.shape_cast %74 : vector<1x32x8xf32> to vector<32x8xf32>
    %cst_89 = arith.constant dense<0.000000e+00> : vector<8x8xf32>
    %76 = tpu.matmul %45, %75, %cst_89 {dimension_numbers = #tpu.dot_dimension_numbers<[1], [0], [0], [1], [0, 0, 1, 1], [], []>} : vector<8x32xf32>, vector<32x8xf32>, vector<8x8xf32> -> vector<8x8xf32>
    %77 = vector.broadcast %59 : vector<1x8xf32> to vector<8x8xf32>
    %78 = arith.addf %76, %77 : vector<8x8xf32>
    %c0_90 = arith.constant 0 : index
    %c0_91 = arith.constant 0 : index
    %79 = vector.load %arg22[%c0_90, %c0_91] : memref<8x8xf32, #tpu.memory_space<vmem>>, vector<8x8xf32>
    tpu.vector_store %arg22[%c0_90, %c0_91], %78 {strides = array<i32>} : memref<8x8xf32, #tpu.memory_space<vmem>>, vector<8x8xf32>,
    %c3_92 = arith.constant 3 : index
    %c0_93 = arith.constant 0 : index
    %c0_94 = arith.constant 0 : index
    %80 = vector.load %arg4[%c3_92, %c0_93, %c0_94] : memref<4x32x8xf32, #tpu.memory_space<vmem>>, vector<1x32x8xf32>
    %81 = vector.shape_cast %80 : vector<1x32x8xf32> to vector<32x8xf32>
    %cst_95 = arith.constant dense<0.000000e+00> : vector<8x8xf32>
    %82 = tpu.matmul %45, %81, %cst_95 {dimension_numbers = #tpu.dot_dimension_numbers<[1], [0], [0], [1], [0, 0, 1, 1], [], []>} : vector<8x32xf32>, vector<32x8xf32>, vector<8x8xf32> -> vector<8x8xf32>
    %83 = vector.broadcast %61 : vector<1x8xf32> to vector<8x8xf32>
    %84 = arith.addf %82, %83 : vector<8x8xf32>
    %c0_96 = arith.constant 0 : index
    %c0_97 = arith.constant 0 : index
    %85 = vector.load %arg23[%c0_96, %c0_97] : memref<8x8xf32, #tpu.memory_space<vmem>>, vector<8x8xf32>
    tpu.vector_store %arg23[%c0_96, %c0_97], %84 {strides = array<i32>} : memref<8x8xf32, #tpu.memory_space<vmem>>, vector<8x8xf32>,
    %cst_98 = arith.constant 0.000000e+00 : f32
    %86 = vector.broadcast %cst_98 : f32 to vector<1x8xf32>
    %cst_99 = arith.constant 0.000000e+00 : f32
    %87 = vector.broadcast %cst_99 : f32 to vector<1x8xf32>
    %c0_i32_100 = arith.constant 0 : i32
    %c8_i32_101 = arith.constant 8 : i32
    %88 = arith.addi %c0_i32_100, %c8_i32_101 : i32
    %c1_i32_102 = arith.constant 1 : i32
    %89:2 = scf.for %arg35 = %c0_i32_100 to %88 step %c1_i32_102 iter_args(%arg36 = %86, %arg37 = %87) -> (vector<1x8xf32>, vector<1x8xf32>)  : i32 {
      %cst_213 = arith.constant dense<0.000000e+00> : vector<1x8xf32>
      %176 = tpu.matmul %arg36, %47, %cst_213 {dimension_numbers = #tpu.dot_dimension_numbers<[1], [0], [0], [1], [0, 0, 1, 1], [], []>} : vector<1x8xf32>, vector<8x8xf32>, vector<1x8xf32> -> vector<1x8xf32>
      %177 = arith.index_cast %arg35 : i32 to index
      %c0_214 = arith.constant 0 : index
      %178 = vector.load %arg20[%177, %c0_214] : memref<8x8xf32, #tpu.memory_space<vmem>>, vector<1x8xf32>
      %179 = arith.addf %178, %176 : vector<1x8xf32>
      %cst_215 = arith.constant dense<0.000000e+00> : vector<1x8xf32>
      %180 = tpu.matmul %arg36, %49, %cst_215 {dimension_numbers = #tpu.dot_dimension_numbers<[1], [0], [0], [1], [0, 0, 1, 1], [], []>} : vector<1x8xf32>, vector<8x8xf32>, vector<1x8xf32> -> vector<1x8xf32>
      %181 = arith.index_cast %arg35 : i32 to index
      %c0_216 = arith.constant 0 : index
      %182 = vector.load %arg21[%181, %c0_216] : memref<8x8xf32, #tpu.memory_space<vmem>>, vector<1x8xf32>
      %183 = arith.addf %182, %180 : vector<1x8xf32>
      %cst_217 = arith.constant dense<0.000000e+00> : vector<1x8xf32>
      %184 = tpu.matmul %arg36, %51, %cst_217 {dimension_numbers = #tpu.dot_dimension_numbers<[1], [0], [0], [1], [0, 0, 1, 1], [], []>} : vector<1x8xf32>, vector<8x8xf32>, vector<1x8xf32> -> vector<1x8xf32>
      %185 = arith.index_cast %arg35 : i32 to index
      %c0_218 = arith.constant 0 : index
      %186 = vector.load %arg22[%185, %c0_218] : memref<8x8xf32, #tpu.memory_space<vmem>>, vector<1x8xf32>
      %187 = arith.addf %186, %184 : vector<1x8xf32>
      %cst_219 = arith.constant dense<0.000000e+00> : vector<1x8xf32>
      %188 = tpu.matmul %arg36, %53, %cst_219 {dimension_numbers = #tpu.dot_dimension_numbers<[1], [0], [0], [1], [0, 0, 1, 1], [], []>} : vector<1x8xf32>, vector<8x8xf32>, vector<1x8xf32> -> vector<1x8xf32>
      %189 = arith.index_cast %arg35 : i32 to index
      %c0_220 = arith.constant 0 : index
      %190 = vector.load %arg23[%189, %c0_220] : memref<8x8xf32, #tpu.memory_space<vmem>>, vector<1x8xf32>
      %191 = arith.addf %190, %188 : vector<1x8xf32>
      %192 = arith.negf %179 : vector<1x8xf32>
      %193 = math.exp %192 : vector<1x8xf32>
      %cst_221 = arith.constant 1.000000e+00 : f32
      %194 = vector.broadcast %cst_221 : f32 to vector<1x8xf32>
      %195 = arith.addf %194, %193 : vector<1x8xf32>
      %196 = arith.divf %194, %195 : vector<1x8xf32>
      %197 = arith.negf %183 : vector<1x8xf32>
      %198 = math.exp %197 : vector<1x8xf32>
      %cst_222 = arith.constant 1.000000e+00 : f32
      %199 = vector.broadcast %cst_222 : f32 to vector<1x8xf32>
      %200 = arith.addf %199, %198 : vector<1x8xf32>
      %201 = arith.divf %199, %200 : vector<1x8xf32>
      %202 = math.tanh %187 : vector<1x8xf32>
      %203 = arith.negf %191 : vector<1x8xf32>
      %204 = math.exp %203 : vector<1x8xf32>
      %cst_223 = arith.constant 1.000000e+00 : f32
      %205 = vector.broadcast %cst_223 : f32 to vector<1x8xf32>
      %206 = arith.addf %205, %204 : vector<1x8xf32>
      %207 = arith.divf %205, %206 : vector<1x8xf32>
      %208 = arith.mulf %201, %arg37 : vector<1x8xf32>
      %209 = arith.mulf %196, %202 : vector<1x8xf32>
      %210 = arith.addf %208, %209 : vector<1x8xf32>
      %211 = math.tanh %210 : vector<1x8xf32>
      %212 = arith.mulf %207, %211 : vector<1x8xf32>
      scf.yield %212, %210 : vector<1x8xf32>, vector<1x8xf32>
    }
    %c8_i32_103 = arith.constant 8 : i32
    %90 = math.tanh %89#0 : vector<1x8xf32>
    %c0_104 = arith.constant 0 : index
    %c0_105 = arith.constant 0 : index
    %c0_106 = arith.constant 0 : index
    %91 = vector.load %arg8[%c0_104, %c0_105, %c0_106] : memref<4x32x32xf32, #tpu.memory_space<vmem>>, vector<1x32x32xf32>
    %92 = vector.shape_cast %91 : vector<1x32x32xf32> to vector<32x32xf32>
    %c1_107 = arith.constant 1 : index
    %c0_108 = arith.constant 0 : index
    %c0_109 = arith.constant 0 : index
    %93 = vector.load %arg8[%c1_107, %c0_108, %c0_109] : memref<4x32x32xf32, #tpu.memory_space<vmem>>, vector<1x32x32xf32>
    %94 = vector.shape_cast %93 : vector<1x32x32xf32> to vector<32x32xf32>
    %c2_110 = arith.constant 2 : index
    %c0_111 = arith.constant 0 : index
    %c0_112 = arith.constant 0 : index
    %95 = vector.load %arg8[%c2_110, %c0_111, %c0_112] : memref<4x32x32xf32, #tpu.memory_space<vmem>>, vector<1x32x32xf32>
    %96 = vector.shape_cast %95 : vector<1x32x32xf32> to vector<32x32xf32>
    %c3_113 = arith.constant 3 : index
    %c0_114 = arith.constant 0 : index
    %c0_115 = arith.constant 0 : index
    %97 = vector.load %arg8[%c3_113, %c0_114, %c0_115] : memref<4x32x32xf32, #tpu.memory_space<vmem>>, vector<1x32x32xf32>
    %98 = vector.shape_cast %97 : vector<1x32x32xf32> to vector<32x32xf32>
    %c0_116 = arith.constant 0 : index
    %c0_117 = arith.constant 0 : index
    %c0_118 = arith.constant 0 : index
    %99 = vector.load %arg9[%c0_116, %c0_117, %c0_118] : memref<4x1x32xf32, #tpu.memory_space<vmem>>, vector<1x1x32xf32>
    %100 = vector.shape_cast %99 : vector<1x1x32xf32> to vector<1x32xf32>
    %c1_119 = arith.constant 1 : index
    %c0_120 = arith.constant 0 : index
    %c0_121 = arith.constant 0 : index
    %101 = vector.load %arg9[%c1_119, %c0_120, %c0_121] : memref<4x1x32xf32, #tpu.memory_space<vmem>>, vector<1x1x32xf32>
    %102 = vector.shape_cast %101 : vector<1x1x32xf32> to vector<1x32xf32>
    %c2_122 = arith.constant 2 : index
    %c0_123 = arith.constant 0 : index
    %c0_124 = arith.constant 0 : index
    %103 = vector.load %arg9[%c2_122, %c0_123, %c0_124] : memref<4x1x32xf32, #tpu.memory_space<vmem>>, vector<1x1x32xf32>
    %104 = vector.shape_cast %103 : vector<1x1x32xf32> to vector<1x32xf32>
    %c3_125 = arith.constant 3 : index
    %c0_126 = arith.constant 0 : index
    %c0_127 = arith.constant 0 : index
    %105 = vector.load %arg9[%c3_125, %c0_126, %c0_127] : memref<4x1x32xf32, #tpu.memory_space<vmem>>, vector<1x1x32xf32>
    %106 = vector.shape_cast %105 : vector<1x1x32xf32> to vector<1x32xf32>
    %c0_128 = arith.constant 0 : index
    %c0_129 = arith.constant 0 : index
    %c0_130 = arith.constant 0 : index
    %107 = vector.load %arg7[%c0_128, %c0_129, %c0_130] : memref<4x8x32xf32, #tpu.memory_space<vmem>>, vector<1x8x32xf32>
    %108 = vector.shape_cast %107 : vector<1x8x32xf32> to vector<8x32xf32>
    %cst_131 = arith.constant dense<0.000000e+00> : vector<1x32xf32>
    %109 = tpu.matmul %90, %108, %cst_131 {dimension_numbers = #tpu.dot_dimension_numbers<[1], [0], [0], [1], [0, 0, 1, 1], [], []>} : vector<1x8xf32>, vector<8x32xf32>, vector<1x32xf32> -> vector<1x32xf32>
    %110 = arith.addf %109, %100 : vector<1x32xf32>
    %c1_132 = arith.constant 1 : index
    %c0_133 = arith.constant 0 : index
    %c0_134 = arith.constant 0 : index
    %111 = vector.load %arg7[%c1_132, %c0_133, %c0_134] : memref<4x8x32xf32, #tpu.memory_space<vmem>>, vector<1x8x32xf32>
    %112 = vector.shape_cast %111 : vector<1x8x32xf32> to vector<8x32xf32>
    %cst_135 = arith.constant dense<0.000000e+00> : vector<1x32xf32>
    %113 = tpu.matmul %90, %112, %cst_135 {dimension_numbers = #tpu.dot_dimension_numbers<[1], [0], [0], [1], [0, 0, 1, 1], [], []>} : vector<1x8xf32>, vector<8x32xf32>, vector<1x32xf32> -> vector<1x32xf32>
    %114 = arith.addf %113, %102 : vector<1x32xf32>
    %c2_136 = arith.constant 2 : index
    %c0_137 = arith.constant 0 : index
    %c0_138 = arith.constant 0 : index
    %115 = vector.load %arg7[%c2_136, %c0_137, %c0_138] : memref<4x8x32xf32, #tpu.memory_space<vmem>>, vector<1x8x32xf32>
    %116 = vector.shape_cast %115 : vector<1x8x32xf32> to vector<8x32xf32>
    %cst_139 = arith.constant dense<0.000000e+00> : vector<1x32xf32>
    %117 = tpu.matmul %90, %116, %cst_139 {dimension_numbers = #tpu.dot_dimension_numbers<[1], [0], [0], [1], [0, 0, 1, 1], [], []>} : vector<1x8xf32>, vector<8x32xf32>, vector<1x32xf32> -> vector<1x32xf32>
    %118 = arith.addf %117, %104 : vector<1x32xf32>
    %c3_140 = arith.constant 3 : index
    %c0_141 = arith.constant 0 : index
    %c0_142 = arith.constant 0 : index
    %119 = vector.load %arg7[%c3_140, %c0_141, %c0_142] : memref<4x8x32xf32, #tpu.memory_space<vmem>>, vector<1x8x32xf32>
    %120 = vector.shape_cast %119 : vector<1x8x32xf32> to vector<8x32xf32>
    %cst_143 = arith.constant dense<0.000000e+00> : vector<1x32xf32>
    %121 = tpu.matmul %90, %120, %cst_143 {dimension_numbers = #tpu.dot_dimension_numbers<[1], [0], [0], [1], [0, 0, 1, 1], [], []>} : vector<1x8xf32>, vector<8x32xf32>, vector<1x32xf32> -> vector<1x32xf32>
    %122 = arith.addf %121, %106 : vector<1x32xf32>
    %cst_144 = arith.constant 0.000000e+00 : f32
    %123 = vector.broadcast %cst_144 : f32 to vector<1x32xf32>
    %cst_145 = arith.constant 0.000000e+00 : f32
    %124 = vector.broadcast %cst_145 : f32 to vector<1x32xf32>
    %c0_i32_146 = arith.constant 0 : i32
    %c8_i32_147 = arith.constant 8 : i32
    %125 = arith.addi %c0_i32_146, %c8_i32_147 : i32
    %c1_i32_148 = arith.constant 1 : i32
    %126:2 = scf.for %arg35 = %c0_i32_146 to %125 step %c1_i32_148 iter_args(%arg36 = %123, %arg37 = %124) -> (vector<1x32xf32>, vector<1x32xf32>)  : i32 {
      %cst_213 = arith.constant dense<0.000000e+00> : vector<1x32xf32>
      %176 = tpu.matmul %arg36, %92, %cst_213 {dimension_numbers = #tpu.dot_dimension_numbers<[1], [0], [0], [1], [0, 0, 1, 1], [], []>} : vector<1x32xf32>, vector<32x32xf32>, vector<1x32xf32> -> vector<1x32xf32>
      %177 = arith.addf %110, %176 : vector<1x32xf32>
      %cst_214 = arith.constant dense<0.000000e+00> : vector<1x32xf32>
      %178 = tpu.matmul %arg36, %94, %cst_214 {dimension_numbers = #tpu.dot_dimension_numbers<[1], [0], [0], [1], [0, 0, 1, 1], [], []>} : vector<1x32xf32>, vector<32x32xf32>, vector<1x32xf32> -> vector<1x32xf32>
      %179 = arith.addf %114, %178 : vector<1x32xf32>
      %cst_215 = arith.constant dense<0.000000e+00> : vector<1x32xf32>
      %180 = tpu.matmul %arg36, %96, %cst_215 {dimension_numbers = #tpu.dot_dimension_numbers<[1], [0], [0], [1], [0, 0, 1, 1], [], []>} : vector<1x32xf32>, vector<32x32xf32>, vector<1x32xf32> -> vector<1x32xf32>
      %181 = arith.addf %118, %180 : vector<1x32xf32>
      %cst_216 = arith.constant dense<0.000000e+00> : vector<1x32xf32>
      %182 = tpu.matmul %arg36, %98, %cst_216 {dimension_numbers = #tpu.dot_dimension_numbers<[1], [0], [0], [1], [0, 0, 1, 1], [], []>} : vector<1x32xf32>, vector<32x32xf32>, vector<1x32xf32> -> vector<1x32xf32>
      %183 = arith.addf %122, %182 : vector<1x32xf32>
      %184 = arith.negf %177 : vector<1x32xf32>
      %185 = math.exp %184 : vector<1x32xf32>
      %cst_217 = arith.constant 1.000000e+00 : f32
      %186 = vector.broadcast %cst_217 : f32 to vector<1x32xf32>
      %187 = arith.addf %186, %185 : vector<1x32xf32>
      %188 = arith.divf %186, %187 : vector<1x32xf32>
      %189 = arith.negf %179 : vector<1x32xf32>
      %190 = math.exp %189 : vector<1x32xf32>
      %cst_218 = arith.constant 1.000000e+00 : f32
      %191 = vector.broadcast %cst_218 : f32 to vector<1x32xf32>
      %192 = arith.addf %191, %190 : vector<1x32xf32>
      %193 = arith.divf %191, %192 : vector<1x32xf32>
      %194 = math.tanh %181 : vector<1x32xf32>
      %195 = arith.negf %183 : vector<1x32xf32>
      %196 = math.exp %195 : vector<1x32xf32>
      %cst_219 = arith.constant 1.000000e+00 : f32
      %197 = vector.broadcast %cst_219 : f32 to vector<1x32xf32>
      %198 = arith.addf %197, %196 : vector<1x32xf32>
      %199 = arith.divf %197, %198 : vector<1x32xf32>
      %200 = arith.mulf %193, %arg37 : vector<1x32xf32>
      %201 = arith.mulf %188, %194 : vector<1x32xf32>
      %202 = arith.addf %200, %201 : vector<1x32xf32>
      %203 = math.tanh %202 : vector<1x32xf32>
      %204 = arith.mulf %199, %203 : vector<1x32xf32>
      %205 = arith.negf %204 : vector<1x32xf32>
      %206 = math.exp %205 : vector<1x32xf32>
      %cst_220 = arith.constant 1.000000e+00 : f32
      %207 = vector.broadcast %cst_220 : f32 to vector<1x32xf32>
      %208 = arith.addf %207, %206 : vector<1x32xf32>
      %209 = arith.divf %207, %208 : vector<1x32xf32>
      %210 = arith.index_cast %arg35 : i32 to index
      %c0_221 = arith.constant 0 : index
      %211 = vector.load %arg29[%210, %c0_221] : memref<8x32xf32, #tpu.memory_space<vmem>>, vector<1x32xf32>
      tpu.vector_store %arg29[%210, %c0_221], %209 {strides = array<i32>} : memref<8x32xf32, #tpu.memory_space<vmem>>, vector<1x32xf32>,
      scf.yield %204, %202 : vector<1x32xf32>, vector<1x32xf32>
    }
    %c8_i32_149 = arith.constant 8 : i32
    %c0_150 = arith.constant 0 : index
    %c0_151 = arith.constant 0 : index
    %127 = vector.load %arg29[%c0_150, %c0_151] : memref<8x32xf32, #tpu.memory_space<vmem>>, vector<8x32xf32>
    %c0_152 = arith.constant 0 : index
    %c0_153 = arith.constant 0 : index
    %c0_154 = arith.constant 0 : index
    %128 = vector.load %arg11[%c0_152, %c0_153, %c0_154] : memref<4x32x32xf32, #tpu.memory_space<vmem>>, vector<1x32x32xf32>
    %129 = vector.shape_cast %128 : vector<1x32x32xf32> to vector<32x32xf32>
    %c1_155 = arith.constant 1 : index
    %c0_156 = arith.constant 0 : index
    %c0_157 = arith.constant 0 : index
    %130 = vector.load %arg11[%c1_155, %c0_156, %c0_157] : memref<4x32x32xf32, #tpu.memory_space<vmem>>, vector<1x32x32xf32>
    %131 = vector.shape_cast %130 : vector<1x32x32xf32> to vector<32x32xf32>
    %c2_158 = arith.constant 2 : index
    %c0_159 = arith.constant 0 : index
    %c0_160 = arith.constant 0 : index
    %132 = vector.load %arg11[%c2_158, %c0_159, %c0_160] : memref<4x32x32xf32, #tpu.memory_space<vmem>>, vector<1x32x32xf32>
    %133 = vector.shape_cast %132 : vector<1x32x32xf32> to vector<32x32xf32>
    %c3_161 = arith.constant 3 : index
    %c0_162 = arith.constant 0 : index
    %c0_163 = arith.constant 0 : index
    %134 = vector.load %arg11[%c3_161, %c0_162, %c0_163] : memref<4x32x32xf32, #tpu.memory_space<vmem>>, vector<1x32x32xf32>
    %135 = vector.shape_cast %134 : vector<1x32x32xf32> to vector<32x32xf32>
    %c0_164 = arith.constant 0 : index
    %c0_165 = arith.constant 0 : index
    %c0_166 = arith.constant 0 : index
    %136 = vector.load %arg12[%c0_164, %c0_165, %c0_166] : memref<4x1x32xf32, #tpu.memory_space<vmem>>, vector<1x1x32xf32>
    %137 = vector.shape_cast %136 : vector<1x1x32xf32> to vector<1x32xf32>
    %c1_167 = arith.constant 1 : index
    %c0_168 = arith.constant 0 : index
    %c0_169 = arith.constant 0 : index
    %138 = vector.load %arg12[%c1_167, %c0_168, %c0_169] : memref<4x1x32xf32, #tpu.memory_space<vmem>>, vector<1x1x32xf32>
    %139 = vector.shape_cast %138 : vector<1x1x32xf32> to vector<1x32xf32>
    %c2_170 = arith.constant 2 : index
    %c0_171 = arith.constant 0 : index
    %c0_172 = arith.constant 0 : index
    %140 = vector.load %arg12[%c2_170, %c0_171, %c0_172] : memref<4x1x32xf32, #tpu.memory_space<vmem>>, vector<1x1x32xf32>
    %141 = vector.shape_cast %140 : vector<1x1x32xf32> to vector<1x32xf32>
    %c3_173 = arith.constant 3 : index
    %c0_174 = arith.constant 0 : index
    %c0_175 = arith.constant 0 : index
    %142 = vector.load %arg12[%c3_173, %c0_174, %c0_175] : memref<4x1x32xf32, #tpu.memory_space<vmem>>, vector<1x1x32xf32>
    %143 = vector.shape_cast %142 : vector<1x1x32xf32> to vector<1x32xf32>
    %c0_176 = arith.constant 0 : index
    %c0_177 = arith.constant 0 : index
    %c0_178 = arith.constant 0 : index
    %144 = vector.load %arg10[%c0_176, %c0_177, %c0_178] : memref<4x32x32xf32, #tpu.memory_space<vmem>>, vector<1x32x32xf32>
    %145 = vector.shape_cast %144 : vector<1x32x32xf32> to vector<32x32xf32>
    %cst_179 = arith.constant dense<0.000000e+00> : vector<8x32xf32>
    %146 = tpu.matmul %127, %145, %cst_179 {dimension_numbers = #tpu.dot_dimension_numbers<[1], [0], [0], [1], [0, 0, 1, 1], [], []>} : vector<8x32xf32>, vector<32x32xf32>, vector<8x32xf32> -> vector<8x32xf32>
    %147 = vector.broadcast %137 : vector<1x32xf32> to vector<8x32xf32>
    %148 = arith.addf %146, %147 : vector<8x32xf32>
    %c0_180 = arith.constant 0 : index
    %c0_181 = arith.constant 0 : index
    %149 = vector.load %arg30[%c0_180, %c0_181] : memref<8x32xf32, #tpu.memory_space<vmem>>, vector<8x32xf32>
    tpu.vector_store %arg30[%c0_180, %c0_181], %148 {strides = array<i32>} : memref<8x32xf32, #tpu.memory_space<vmem>>, vector<8x32xf32>,
    %c1_182 = arith.constant 1 : index
    %c0_183 = arith.constant 0 : index
    %c0_184 = arith.constant 0 : index
    %150 = vector.load %arg10[%c1_182, %c0_183, %c0_184] : memref<4x32x32xf32, #tpu.memory_space<vmem>>, vector<1x32x32xf32>
    %151 = vector.shape_cast %150 : vector<1x32x32xf32> to vector<32x32xf32>
    %cst_185 = arith.constant dense<0.000000e+00> : vector<8x32xf32>
    %152 = tpu.matmul %127, %151, %cst_185 {dimension_numbers = #tpu.dot_dimension_numbers<[1], [0], [0], [1], [0, 0, 1, 1], [], []>} : vector<8x32xf32>, vector<32x32xf32>, vector<8x32xf32> -> vector<8x32xf32>
    %153 = vector.broadcast %139 : vector<1x32xf32> to vector<8x32xf32>
    %154 = arith.addf %152, %153 : vector<8x32xf32>
    %c0_186 = arith.constant 0 : index
    %c0_187 = arith.constant 0 : index
    %155 = vector.load %arg31[%c0_186, %c0_187] : memref<8x32xf32, #tpu.memory_space<vmem>>, vector<8x32xf32>
    tpu.vector_store %arg31[%c0_186, %c0_187], %154 {strides = array<i32>} : memref<8x32xf32, #tpu.memory_space<vmem>>, vector<8x32xf32>,
    %c2_188 = arith.constant 2 : index
    %c0_189 = arith.constant 0 : index
    %c0_190 = arith.constant 0 : index
    %156 = vector.load %arg10[%c2_188, %c0_189, %c0_190] : memref<4x32x32xf32, #tpu.memory_space<vmem>>, vector<1x32x32xf32>
    %157 = vector.shape_cast %156 : vector<1x32x32xf32> to vector<32x32xf32>
    %cst_191 = arith.constant dense<0.000000e+00> : vector<8x32xf32>
    %158 = tpu.matmul %127, %157, %cst_191 {dimension_numbers = #tpu.dot_dimension_numbers<[1], [0], [0], [1], [0, 0, 1, 1], [], []>} : vector<8x32xf32>, vector<32x32xf32>, vector<8x32xf32> -> vector<8x32xf32>
    %159 = vector.broadcast %141 : vector<1x32xf32> to vector<8x32xf32>
    %160 = arith.addf %158, %159 : vector<8x32xf32>
    %c0_192 = arith.constant 0 : index
    %c0_193 = arith.constant 0 : index
    %161 = vector.load %arg32[%c0_192, %c0_193] : memref<8x32xf32, #tpu.memory_space<vmem>>, vector<8x32xf32>
    tpu.vector_store %arg32[%c0_192, %c0_193], %160 {strides = array<i32>} : memref<8x32xf32, #tpu.memory_space<vmem>>, vector<8x32xf32>,
    %c3_194 = arith.constant 3 : index
    %c0_195 = arith.constant 0 : index
    %c0_196 = arith.constant 0 : index
    %162 = vector.load %arg10[%c3_194, %c0_195, %c0_196] : memref<4x32x32xf32, #tpu.memory_space<vmem>>, vector<1x32x32xf32>
    %163 = vector.shape_cast %162 : vector<1x32x32xf32> to vector<32x32xf32>
    %cst_197 = arith.constant dense<0.000000e+00> : vector<8x32xf32>
    %164 = tpu.matmul %127, %163, %cst_197 {dimension_numbers = #tpu.dot_dimension_numbers<[1], [0], [0], [1], [0, 0, 1, 1], [], []>} : vector<8x32xf32>, vector<32x32xf32>, vector<8x32xf32> -> vector<8x32xf32>
    %165 = vector.broadcast %143 : vector<1x32xf32> to vector<8x32xf32>
    %166 = arith.addf %164, %165 : vector<8x32xf32>
    %c0_198 = arith.constant 0 : index
    %c0_199 = arith.constant 0 : index
    %167 = vector.load %arg33[%c0_198, %c0_199] : memref<8x32xf32, #tpu.memory_space<vmem>>, vector<8x32xf32>
    tpu.vector_store %arg33[%c0_198, %c0_199], %166 {strides = array<i32>} : memref<8x32xf32, #tpu.memory_space<vmem>>, vector<8x32xf32>,
    %cst_200 = arith.constant 0.000000e+00 : f32
    %168 = vector.broadcast %cst_200 : f32 to vector<1x32xf32>
    %cst_201 = arith.constant 0.000000e+00 : f32
    %169 = vector.broadcast %cst_201 : f32 to vector<1x32xf32>
    %c0_i32_202 = arith.constant 0 : i32
    %c8_i32_203 = arith.constant 8 : i32
    %170 = arith.addi %c0_i32_202, %c8_i32_203 : i32
    %c1_i32_204 = arith.constant 1 : i32
    %171:2 = scf.for %arg35 = %c0_i32_202 to %170 step %c1_i32_204 iter_args(%arg36 = %168, %arg37 = %169) -> (vector<1x32xf32>, vector<1x32xf32>)  : i32 {
      %cst_213 = arith.constant dense<0.000000e+00> : vector<1x32xf32>
      %176 = tpu.matmul %arg36, %129, %cst_213 {dimension_numbers = #tpu.dot_dimension_numbers<[1], [0], [0], [1], [0, 0, 1, 1], [], []>} : vector<1x32xf32>, vector<32x32xf32>, vector<1x32xf32> -> vector<1x32xf32>
      %177 = arith.index_cast %arg35 : i32 to index
      %c0_214 = arith.constant 0 : index
      %178 = vector.load %arg30[%177, %c0_214] : memref<8x32xf32, #tpu.memory_space<vmem>>, vector<1x32xf32>
      %179 = arith.addf %178, %176 : vector<1x32xf32>
      %cst_215 = arith.constant dense<0.000000e+00> : vector<1x32xf32>
      %180 = tpu.matmul %arg36, %131, %cst_215 {dimension_numbers = #tpu.dot_dimension_numbers<[1], [0], [0], [1], [0, 0, 1, 1], [], []>} : vector<1x32xf32>, vector<32x32xf32>, vector<1x32xf32> -> vector<1x32xf32>
      %181 = arith.index_cast %arg35 : i32 to index
      %c0_216 = arith.constant 0 : index
      %182 = vector.load %arg31[%181, %c0_216] : memref<8x32xf32, #tpu.memory_space<vmem>>, vector<1x32xf32>
      %183 = arith.addf %182, %180 : vector<1x32xf32>
      %cst_217 = arith.constant dense<0.000000e+00> : vector<1x32xf32>
      %184 = tpu.matmul %arg36, %133, %cst_217 {dimension_numbers = #tpu.dot_dimension_numbers<[1], [0], [0], [1], [0, 0, 1, 1], [], []>} : vector<1x32xf32>, vector<32x32xf32>, vector<1x32xf32> -> vector<1x32xf32>
      %185 = arith.index_cast %arg35 : i32 to index
      %c0_218 = arith.constant 0 : index
      %186 = vector.load %arg32[%185, %c0_218] : memref<8x32xf32, #tpu.memory_space<vmem>>, vector<1x32xf32>
      %187 = arith.addf %186, %184 : vector<1x32xf32>
      %cst_219 = arith.constant dense<0.000000e+00> : vector<1x32xf32>
      %188 = tpu.matmul %arg36, %135, %cst_219 {dimension_numbers = #tpu.dot_dimension_numbers<[1], [0], [0], [1], [0, 0, 1, 1], [], []>} : vector<1x32xf32>, vector<32x32xf32>, vector<1x32xf32> -> vector<1x32xf32>
      %189 = arith.index_cast %arg35 : i32 to index
      %c0_220 = arith.constant 0 : index
      %190 = vector.load %arg33[%189, %c0_220] : memref<8x32xf32, #tpu.memory_space<vmem>>, vector<1x32xf32>
      %191 = arith.addf %190, %188 : vector<1x32xf32>
      %192 = arith.negf %179 : vector<1x32xf32>
      %193 = math.exp %192 : vector<1x32xf32>
      %cst_221 = arith.constant 1.000000e+00 : f32
      %194 = vector.broadcast %cst_221 : f32 to vector<1x32xf32>
      %195 = arith.addf %194, %193 : vector<1x32xf32>
      %196 = arith.divf %194, %195 : vector<1x32xf32>
      %197 = arith.negf %183 : vector<1x32xf32>
      %198 = math.exp %197 : vector<1x32xf32>
      %cst_222 = arith.constant 1.000000e+00 : f32
      %199 = vector.broadcast %cst_222 : f32 to vector<1x32xf32>
      %200 = arith.addf %199, %198 : vector<1x32xf32>
      %201 = arith.divf %199, %200 : vector<1x32xf32>
      %202 = math.tanh %187 : vector<1x32xf32>
      %203 = arith.negf %191 : vector<1x32xf32>
      %204 = math.exp %203 : vector<1x32xf32>
      %cst_223 = arith.constant 1.000000e+00 : f32
      %205 = vector.broadcast %cst_223 : f32 to vector<1x32xf32>
      %206 = arith.addf %205, %204 : vector<1x32xf32>
      %207 = arith.divf %205, %206 : vector<1x32xf32>
      %208 = arith.mulf %201, %arg37 : vector<1x32xf32>
      %209 = arith.mulf %196, %202 : vector<1x32xf32>
      %210 = arith.addf %208, %209 : vector<1x32xf32>
      %211 = math.tanh %210 : vector<1x32xf32>
      %212 = arith.mulf %207, %211 : vector<1x32xf32>
      %213 = arith.index_cast %arg35 : i32 to index
      %c0_224 = arith.constant 0 : index
      %214 = vector.load %arg34[%213, %c0_224] : memref<8x32xf32, #tpu.memory_space<vmem>>, vector<1x32xf32>
      tpu.vector_store %arg34[%213, %c0_224], %212 {strides = array<i32>} : memref<8x32xf32, #tpu.memory_space<vmem>>, vector<1x32xf32>,
      scf.yield %212, %210 : vector<1x32xf32>, vector<1x32xf32>
    }
    %c8_i32_205 = arith.constant 8 : i32
    %c0_206 = arith.constant 0 : index
    %c0_207 = arith.constant 0 : index
    %172 = vector.load %arg34[%c0_206, %c0_207] : memref<8x32xf32, #tpu.memory_space<vmem>>, vector<8x32xf32>
    %c0_208 = arith.constant 0 : index
    %c0_209 = arith.constant 0 : index
    %173 = vector.load %arg13[%c0_208, %c0_209] : memref<32x16xf32, #tpu.memory_space<vmem>>, vector<32x16xf32>
    %cst_210 = arith.constant dense<0.000000e+00> : vector<8x16xf32>
    %174 = tpu.matmul %172, %173, %cst_210 {dimension_numbers = #tpu.dot_dimension_numbers<[1], [0], [0], [1], [0, 0, 1, 1], [], []>} : vector<8x32xf32>, vector<32x16xf32>, vector<8x16xf32> -> vector<8x16xf32>
    %c0_211 = arith.constant 0 : index
    %c0_212 = arith.constant 0 : index
    %175 = vector.load %arg14[%c0_211, %c0_212] : memref<8x16xf32, #tpu.memory_space<vmem>>, vector<8x16xf32>
    tpu.vector_store %arg14[%c0_211, %c0_212], %174 {strides = array<i32>} : memref<8x16xf32, #tpu.memory_space<vmem>>, vector<8x16xf32>,
    return
  }
}

</mosaic_0001>

<bundles_post_ra>
// kernel: lstm_ae_forward.1
= control target key start
LH: loop header
LB: loop body
LE: loop exit
PB: predicated region body
PF: predicated region fallthrough
CT: control target
= control target key end

     0   :  { %19 = vsyncpa [#allocation23], 0  ;;  %s4917_s0 = inlined_call_operand.vmem [shape: f32[8,16], index: 0, kind: input, shape index: {}]   ;;  %s4918_s1 = inlined_call_operand.vmem [shape: f32[4,16,32], index: 1, kind: input, shape index: {}]   ;;  %s4919_s2 = inlined_call_operand.vmem [shape: f32[4,32,32], index: 2, kind: input, shape index: {}]   ;;  %s4920_s3 = inlined_call_operand.vmem [shape: f32[4,1,32], index: 3, kind: input, shape index: {}]   ;;  %s4921_s4 = inlined_call_operand.vmem [shape: f32[4,32,8], index: 4, kind: input, shape index: {}]   ;;  %s4922_s5 = inlined_call_operand.hbm [shape: f32[4,8,8], index: 5, kind: input, shape index: {}]   ;;  %s4923_s6 = inlined_call_operand.vmem [shape: f32[4,1,8], index: 6, kind: input, shape index: {}]   ;;  %s4924_s7 = inlined_call_operand.hbm [shape: f32[4,8,32], index: 7, kind: input, shape index: {}]   ;;  %s4925_s8 = inlined_call_operand.hbm [shape: f32[4,32,32], index: 8, kind: input, shape index: {}]   ;;  %s4926_s9 = inlined_call_operand.hbm [shape: f32[4,1,32], index: 9, kind: input, shape index: {}]   ;;  %s4927_s10 = inlined_call_operand.hbm [shape: f32[4,32,32], index: 10, kind: input, shape index: {}]   ;;  %s4928_s11 = inlined_call_operand.hbm [shape: f32[4,32,32], index: 11, kind: input, shape index: {}]   ;;  %s4929_s12 = inlined_call_operand.hbm [shape: f32[4,1,32], index: 12, kind: input, shape index: {}]   ;;  %s4930_s13 = inlined_call_operand.vmem [shape: f32[32,16], index: 13, kind: input, shape index: {}]   ;;  %s4931_s14 = inlined_call_operand.hbm [shape: f32[8,16], index: 14, kind: output, shape index: {}]  }
   0x1   :  { %20 = vsyncpa [#allocation26], 0 }
   0x2   :  { %21 = vsyncpa [#allocation29], 0 }
   0x3   :  { %22 = vsyncpa [#allocation32], 0 }
   0x4   :  { %23 = vsyncpa [#allocation24], 0  ;;  %s4134_s29 = smov [#allocation25]   ;;  %s4135_s15 = smov [#allocation28]  }
   0x5   :  { %s53_s30 = sshll.u32 %s4134_s29, 4  ;;  %s77_s16 = sshll.u32 %s4135_s15, 4  ;;  %s54_s30 = int_to_ptr.vmem [resolvable:$true] %s53_s30  ;;  %s4235_s16 = int_to_ptr.vmem [resolvable:$true] %s77_s16 }
   0x6   :  { %s3852_s19 = scalar_lea.hbm %s4924_s7, 512 }
   0x7   :  { %p3853_p0 = scmp.ne.s32.totalorder %s4924_s7, %s3852_s19  ;;  %p3856_p1 = scmp.lt.u32.totalorder %s3852_s19, %s4924_s7 }
   0x9   :  { %p3858_p2 = pnand %p3856_p1, %p3853_p0 }
   0xb   :  { %3861 = shalt.err (!%p3858_p2)
}
   0xc   :  { %s3862_s24 = scalar_lea.vmem %s54_s30, 512  ;;  %p3867_p4 = scmp.lt.s32.totalorder %s54_s30, %s54_s30 }
   0xd   :  { %p3863_p3 = scmp.ne.s32.totalorder %s54_s30, %s3862_s24  ;;  %p3868_p5 = scmp.lt.s32.totalorder %s3862_s24, %s3862_s24 }
   0xf   :  { %p3869_p6 = por %p3868_p5, %p3867_p4 }
  0x11   :  { %p3870_p7 = pnand %p3869_p6, %p3863_p3 }
  0x13   :  { %3873 = shalt.err (!%p3870_p7)
}
  0x14   :  { %s4932_s25 = smov 128   ;;  %s4137_s26 = smov 8  }
  0x15   :  { %59 = dma.hbm_to_vmem [thread:$0]  %s4924_s7, 512, %s54_s30, [#allocation26], %s4932_s25, %s4932_s25, %s4137_s26  }
  0x16   :  { %s3874_s17 = scalar_lea.hbm %s4926_s9, 64 }
  0x17   :  { %p3875_p8 = scmp.ne.s32.totalorder %s4926_s9, %s3874_s17  ;;  %p3878_p9 = scmp.lt.u32.totalorder %s3874_s17, %s4926_s9 }
  0x19   :  { %p3880_p10 = pnand %p3878_p9, %p3875_p8 }
  0x1b   :  { %3883 = shalt.err (!%p3880_p10)
}
  0x1c   :  { %s3884_s22 = scalar_lea.vmem %s4235_s16, 64  ;;  %p3889_p12 = scmp.lt.s32.totalorder %s4235_s16, %s4235_s16 }
  0x1d   :  { %p3885_p11 = scmp.ne.s32.totalorder %s4235_s16, %s3884_s22  ;;  %p3890_p13 = scmp.lt.s32.totalorder %s3884_s22, %s3884_s22 }
  0x1f   :  { %p3891_p0 = por %p3890_p13, %p3889_p12 }
  0x21   :  { %p3892_p1 = pnand %p3891_p0, %p3885_p11 }
  0x23   :  { %3895 = shalt.err (!%p3892_p1)
}
  0x24   :  { %s4138_s7 = smov 16   ;;  %s4139_s30 = smov 1  }
  0x25   :  { %83 = dma.hbm_to_vmem [thread:$0]  %s4926_s9, 64, %s4235_s16, [#allocation29], %s4138_s7, %s4138_s7, %s4139_s30  }
  0x26   :  { %s4140_s27 = smov [#allocation31]   ;;  %s4141_s29 = smov [#allocation22]  }
  0x27   :  { %s101_s28 = sshll.u32 %s4140_s27, 4  ;;  %s39_s15 = sshll.u32 %s4141_s29, 4  ;;  %s102_s28 = int_to_ptr.vmem [resolvable:$true] %s101_s28  ;;  %s4272_s15 = int_to_ptr.vmem [resolvable:$true] %s39_s15 }
  0x28   :  { %s3896_s19 = scalar_lea.hbm %s4928_s11, 2048 }
  0x29   :  { %p3897_p2 = scmp.ne.s32.totalorder %s4928_s11, %s3896_s19  ;;  %p3900_p3 = scmp.lt.u32.totalorder %s3896_s19, %s4928_s11 }
  0x2b   :  { %p3902_p4 = pnand %p3900_p3, %p3897_p2 }
  0x2d   :  { %3905 = shalt.err (!%p3902_p4)
}
  0x2e   :  { %s3906_s9 = scalar_lea.vmem %s102_s28, 2048  ;;  %p3911_p6 = scmp.lt.s32.totalorder %s102_s28, %s102_s28 }
  0x2f   :  { %p3907_p5 = scmp.ne.s32.totalorder %s102_s28, %s3906_s9  ;;  %p3912_p7 = scmp.lt.s32.totalorder %s3906_s9, %s3906_s9 }
  0x31   :  { %p3913_p8 = por %p3912_p7, %p3911_p6 }
  0x33   :  { %p3914_p9 = pnand %p3913_p8, %p3907_p5 }
  0x35   :  { %3917 = shalt.err (!%p3914_p9)
}
  0x36   :  { %s4934_s16 = smov 128   ;;  %s3918_s25 = scalar_lea.hbm %s4922_s5, 512 }
  0x37   :  { %107 = dma.hbm_to_vmem [thread:$0]  %s4928_s11, 2048, %s102_s28, [#allocation32], %s4934_s16, %s4934_s16, %s4137_s26  }
  0x38   :  { %p3919_p10 = scmp.ne.s32.totalorder %s4922_s5, %s3918_s25  ;;  %p3922_p11 = scmp.lt.u32.totalorder %s3918_s25, %s4922_s5 }
  0x3a   :  { %p3924_p12 = pnand %p3922_p11, %p3919_p10 }
  0x3c   :  { %3927 = shalt.err (!%p3924_p12)
}
  0x3d   :  { %s3928_s21 = scalar_lea.vmem %s4272_s15, 512  ;;  %p3933_p0 = scmp.lt.s32.totalorder %s4272_s15, %s4272_s15 }
  0x3e   :  { %p3929_p13 = scmp.ne.s32.totalorder %s4272_s15, %s3928_s21  ;;  %p3934_p1 = scmp.lt.s32.totalorder %s3928_s21, %s3928_s21 }
  0x40   :  { %p3935_p2 = por %p3934_p1, %p3933_p0 }
  0x42   :  { %p3936_p3 = pnand %p3935_p2, %p3929_p13 }
  0x44   :  { %3939 = shalt.err (!%p3936_p3)
}
  0x45   :  { %45 = dma.hbm_to_vmem [thread:$0]  %s4922_s5, 512, %s4272_s15, [#allocation23], %s4934_s16, %s4934_s16, %s4137_s26  }
  0x46   :  { %s4142_s22 = smov [#allocation27]   ;;  %s4143_s23 = smov [#allocation30]  }
  0x47   :  { %s65_s9 = sshll.u32 %s4142_s22, 4  ;;  %s89_s24 = sshll.u32 %s4143_s23, 4  ;;  %s66_s9 = int_to_ptr.vmem [resolvable:$true] %s65_s9  ;;  %s4309_s24 = int_to_ptr.vmem [resolvable:$true] %s89_s24 }
  0x48   :  { %s3940_s25 = scalar_lea.hbm %s4925_s8, 2048 }
  0x49   :  { %p3941_p4 = scmp.ne.s32.totalorder %s4925_s8, %s3940_s25  ;;  %p3944_p5 = scmp.lt.u32.totalorder %s3940_s25, %s4925_s8 }
  0x4b   :  { %p3946_p6 = pnand %p3944_p5, %p3941_p4 }
  0x4d   :  { %3949 = shalt.err (!%p3946_p6)
}
  0x4e   :  { %s3950_s5 = scalar_lea.vmem %s66_s9, 2048  ;;  %p3955_p8 = scmp.lt.s32.totalorder %s66_s9, %s66_s9 }
  0x4f   :  { %p3951_p7 = scmp.ne.s32.totalorder %s66_s9, %s3950_s5  ;;  %p3956_p9 = scmp.lt.s32.totalorder %s3950_s5, %s3950_s5 }
  0x51   :  { %p3957_p10 = por %p3956_p9, %p3955_p8 }
  0x53   :  { %p3958_p11 = pnand %p3957_p10, %p3951_p7 }
  0x55   :  { %3961 = shalt.err (!%p3958_p11)
}
  0x56   :  { %71 = dma.hbm_to_vmem [thread:$0]  %s4925_s8, 2048, %s66_s9, [#allocation26], %s4934_s16, %s4934_s16, %s4137_s26  }
  0x57   :  { %s3962_s22 = scalar_lea.hbm %s4927_s10, 2048 }
  0x58   :  { %p3963_p12 = scmp.ne.s32.totalorder %s4927_s10, %s3962_s22  ;;  %p3966_p13 = scmp.lt.u32.totalorder %s3962_s22, %s4927_s10 }
  0x5a   :  { %p3968_p0 = pnand %p3966_p13, %p3963_p12 }
  0x5c   :  { %3971 = shalt.err (!%p3968_p0)
}
  0x5d   :  { %s3972_s17 = scalar_lea.vmem %s4309_s24, 2048  ;;  %p3977_p2 = scmp.lt.s32.totalorder %s4309_s24, %s4309_s24 }
  0x5e   :  { %p3973_p1 = scmp.ne.s32.totalorder %s4309_s24, %s3972_s17  ;;  %p3978_p3 = scmp.lt.s32.totalorder %s3972_s17, %s3972_s17 }
  0x60   :  { %p3979_p4 = por %p3978_p3, %p3977_p2 }
  0x62   :  { %p3980_p5 = pnand %p3979_p4, %p3973_p1 }
  0x64   :  { %3983 = shalt.err (!%p3980_p5)
}
  0x65   :  { %95 = dma.hbm_to_vmem [thread:$0]  %s4927_s10, 2048, %s4309_s24, [#allocation29], %s4934_s16, %s4934_s16, %s4137_s26  }
  0x66   :  { %s4144_s18 = smov [#allocation33]   ;;  %s3984_s15 = scalar_lea.hbm %s4929_s12, 64 }
  0x67   :  { %s113_s19 = sshll.u32 %s4144_s18, 4  ;;  %p3985_p6 = scmp.ne.s32.totalorder %s4929_s12, %s3984_s15  ;;  %s114_s19 = int_to_ptr.vmem [resolvable:$true] %s113_s19 }
  0x68   :  { %p3988_p7 = scmp.lt.u32.totalorder %s3984_s15, %s4929_s12 }
  0x6a   :  { %p3990_p8 = pnand %p3988_p7, %p3985_p6 }
  0x6c   :  { %3993 = shalt.err (!%p3990_p8)
}
  0x6d   :  { %s3994_s23 = scalar_lea.vmem %s114_s19, 64  ;;  %p3999_p10 = scmp.lt.s32.totalorder %s114_s19, %s114_s19 }
  0x6e   :  { %p3995_p9 = scmp.ne.s32.totalorder %s114_s19, %s3994_s23  ;;  %p4000_p11 = scmp.lt.s32.totalorder %s3994_s23, %s3994_s23 }
  0x70   :  { %p4001_p12 = por %p4000_p11, %p3999_p10 }
  0x72   :  { %p4002_p13 = pnand %p4001_p12, %p3995_p9 }
  0x74   :  { %4005 = shalt.err (!%p4002_p13)
}
  0x75   :  { %119 = dma.hbm_to_vmem [thread:$0]  %s4929_s12, 64, %s114_s19, [#allocation32], %s4138_s7, %s4138_s7, %s4139_s30  }
  0x76   :  { %4076 = dma.done.wait [#allocation23], 512  }
  0x77   :  { %4077 = vsyncadd [#allocation23], 4294966784 }
  0x78   :  { %4078 = dma.done.wait [#allocation26], 2560  }
  0x79   :  { %4079 = vsyncadd [#allocation26], 4294964736 }
  0x7a   :  { %4080 = dma.done.wait [#allocation29], 2112  }
  0x7b   :  { %4081 = vsyncadd [#allocation29], 4294965184 }
  0x7c   :  { %4082 = dma.done.wait [#allocation32], 2112  }
  0x7d   :  { %4083 = vsyncadd [#allocation32], 4294965184  ;;  %v4145_v0 = vmov 0.0|0.0   ;;  %vm4146_vm0 = vmmov 0   ;;  %v4147_v1 = vmov 0.0   ;;  %v4370_v2 = vld [vmem:[%s4919_s2] sm:$0xff] }
  0x7e   :  { %3518 = vmatprep.subr.bf16.mxu0 %v4145_v0  ;;  %3521 = vmatprep.subr.bf16.mxu1 %v4145_v0  ;;  %v4375_v3 = vld [vmem:[%s4919_s2 + $0x8] sm:$0xff]  ;;  %v4380_v4 = vld [vmem:[%s4919_s2 + $0x10] sm:$0xff]  ;;  %v4385_v5 = vld [vmem:[%s4919_s2 + $0x18] sm:$0xff]  ;;  %vm178_vm1 = vcmask 130048   ;;  %vm252_vm2 = vcmask 261120   ;;  %v4500_v47 = vmov 0.0  }
  0x7f   :  { %3223 = vmatprep.mubr.msk.f32.mxu0 %vm4146_vm0, %v4147_v1  ;;  %3230 = vmatprep.mubr.msk.f32.mxu1 %vm4146_vm0, %v4147_v1  ;;  %v4390_v6 = vld [vmem:[%s4919_s2 + $0x20] sm:$0xff]  ;;  %v4395_v7 = vld [vmem:[%s4919_s2 + $0x28] sm:$0xff]  ;;  %v4400_v8 = vld [vmem:[%s4919_s2 + $0x30] sm:$0xff]  ;;  %v4502_v48 = vmov 0.0   ;;  %s4504_s8 = smov 0  }
  0x80   :  { %v4405_v9 = vld [vmem:[%s4919_s2 + $0x38] sm:$0xff]  ;;  %v4410_v10 = vld [vmem:[%s4919_s2 + $0x40] sm:$0xff]  ;;  %v4415_v11 = vld [vmem:[%s4919_s2 + $0x48] sm:$0xff] }
  0x81   :  { %v4420_v12 = vld [vmem:[%s4919_s2 + $0x50] sm:$0xff]  ;;  %v4425_v13 = vld [vmem:[%s4919_s2 + $0x58] sm:$0xff]  ;;  %v4430_v14 = vld [vmem:[%s4919_s2 + $0x60] sm:$0xff] }
  0x82   :  { %v4435_v15 = vld [vmem:[%s4919_s2 + $0x68] sm:$0xff]  ;;  %v4440_v16 = vld [vmem:[%s4919_s2 + $0x70] sm:$0xff]  ;;  %v4445_v17 = vld [vmem:[%s4919_s2 + $0x78] sm:$0xff] }
  0x83   :  { %v170_v18 = vld [vmem:[%s4918_s1] sm:$0xff]  ;;  %v171_v19 = vld [vmem:[%s4918_s1 + $0x8] sm:$0xff]  ;;  %v3008_v21 = vld [vmem:[%s4918_s1 + $0x10] sm:$0xff] }
  0x84   :  { %v3519_v20 = vpack.c.bf16 %v171_v19, %v170_v18  ;;  %v3009_v22 = vld [vmem:[%s4918_s1 + $0x18] sm:$0xff]  ;;  %v3012_v24 = vld [vmem:[%s4918_s1 + $0x20] sm:$0xff]  ;;  %v3013_v25 = vld [vmem:[%s4918_s1 + $0x28] sm:$0xff] }
  0x85   :  { %v3522_v23 = vpack.c.bf16 %v3009_v22, %v3008_v21  ;;  %v3016_v26 = vld [vmem:[%s4918_s1 + $0x30] sm:$0xff]  ;;  %v143_v27 = vld [vmem:[%s4917_s0] sm:$0xff]  ;;  %v3525_v28 = vpack.c.bf16 %v3013_v25, %v3012_v24  ;;  %v3017_v29 = vld [vmem:[%s4918_s1 + $0x38] sm:$0xff] }
  0x86   :  { %3520 = vmatpush3.bf16.msra.mxu0 %v3519_v20  ;;  %v3528_v30 = vpack.c.bf16 %v3017_v29, %v3016_v26  ;;  %v3006_v31 = vld [vmem:[%s4920_s3] ss:$0 sm:$0xff]  ;;  %v3010_v32 = vld [vmem:[%s4920_s3 + $0x1] ss:$0 sm:$0xff]  ;;  %v3014_v39 = vld [vmem:[%s4920_s3 + $0x2] ss:$0 sm:$0xff] }
  0x87   :  { %3523 = vmatpush3.bf16.msra.mxu1 %v3522_v23  ;;  %3524 = vmatprep.subr.bf16.mxu0 %v4145_v0  ;;  %v3018_v40 = vld [vmem:[%s4920_s3 + $0x3] ss:$0 sm:$0xff] }
  0x88   :  { %3527 = vmatprep.subr.bf16.mxu1 %v4145_v0 }
  0x89   :  { %3224 = vmatmul.mubr.msk.f32.vlgmr.msra.gmra.mrb[0].mxu0 %vm178_vm1, %v143_v27 }
  0x8a   :  { %3231 = vmatmul.mubr.msk.f32.vlgmr.msra.gmra.mrb[0].mxu1 %vm178_vm1, %v143_v27  ;;  %3526 = vmatpush3.bf16.msra.mxu0 %v3525_v28 }
  0x8b   :  { %3529 = vmatpush3.bf16.msra.mxu1 %v3528_v30  ;;  %3237 = vmatprep.mubr.msk.f32.mxu0 %vm4146_vm0, %v4147_v1 }
  0x8c   :  { %3244 = vmatprep.mubr.msk.f32.mxu1 %vm4146_vm0, %v4147_v1 }
  0x8d   :  { %3238 = vmatmul.mubr.msk.f32.vlgmr.msra.gmra.mrb[2].mxu0 %vm178_vm1, %v143_v27 }
  0x8e   :  { %3245 = vmatmul.mubr.msk.f32.vlgmr.msra.gmra.mrb[2].mxu1 %vm178_vm1, %v143_v27 }
 0x15c   :  { %v248_v33 = vpop.f32.mrb[0].mxu0 }
 0x15d   :  { %v249_v34 = vadd.f32 %v3006_v31, %v248_v33  ;;  %v329_v35 = vpop.f32.mrb[0].mxu1  ;;  %v3225_v36 = vpop.f32.mrb[1].mxu0 }
 0x15e   :  { %v330_v37 = vadd.f32 %v3010_v32, %v329_v35  ;;  %v3232_v38 = vpop.f32.mrb[1].mxu1 }
 0x15f   :  { %253 = vst.msk [vmem:[#allocation2] sm:$0xff] %vm252_vm2, %v249_v34 }
 0x160   :  { %333 = vst.msk [vmem:[#allocation3] sm:$0xff] %vm252_vm2, %v330_v37  ;;  %v409_v41 = vpop.f32.mrb[2].mxu0 }
 0x161   :  { %v410_v42 = vadd.f32 %v3014_v39, %v409_v41  ;;  %v489_v43 = vpop.f32.mrb[2].mxu1  ;;  %v3239_v44 = vpop.f32.mrb[3].mxu0 }
 0x162   :  { %v490_v45 = vadd.f32 %v3018_v40, %v489_v43  ;;  %v3246_v46 = vpop.f32.mrb[3].mxu1 }
 0x163   :  { %413 = vst.msk [vmem:[#allocation4] sm:$0xff] %vm252_vm2, %v410_v42 }
 0x164   :  { %493 = vst.msk [vmem:[#allocation5] sm:$0xff] %vm252_vm2, %v490_v45 }
 0x165 LB: > { %v3531_v49 = vpack.c.bf16 %v4375_v3, %v4370_v2  ;;  %v3537_v50 = vpack.c.bf16 %v4395_v7, %v4390_v6  ;;  %v4148_v51 = vmov 0.0|0.0   ;;  %v3534_v52 = vpack.c.bf16 %v4385_v5, %v4380_v4  ;;  %s575_s3 = scalar_lea.vmem [#allocation2], %s4096_s8  ;;  %s648_s9 = scalar_lea.vmem [#allocation3], %s4096_s8  ;;  %s4096_s8 = sphi %s4504_s8, %s499_s8   ;;  %v4092_v48 = vphi %v4502_v48, %v820_v48   ;;  %v4088_v47 = vphi %v4500_v47, %v818_v47  }
 0x166   : > { %3530 = vmatprep.subr.bf16.mxu0 %v4148_v51  ;;  %3536 = vmatprep.subr.bf16.mxu1 %v4148_v51  ;;  %v3540_v53 = vpack.c.bf16 %v4405_v9, %v4400_v8  ;;  %vm4149_vm3 = vmmov 0   ;;  %v4150_v54 = vmov 0.0   ;;  %v3543_v55 = vpack.c.bf16 %v4415_v11, %v4410_v10  ;;  %v576_v59 = vld [vmem:[%s575_s3] sm:$0x1]  ;;  %s794_s18 = scalar_lea.vmem [#allocation5], %s4096_s8  ;;  %s721_s19 = scalar_lea.vmem [#allocation4], %s4096_s8 }
 0x167   : > { %3532 = vmatpush3.bf16.msra.mxu0 %v3531_v49  ;;  %3538 = vmatpush3.bf16.msra.mxu1 %v3537_v50  ;;  %v3549_v56 = vpack.c.bf16 %v4435_v15, %v4430_v14  ;;  %v3546_v57 = vpack.c.bf16 %v4425_v13, %v4420_v12  ;;  %v3552_v58 = vpack.c.bf16 %v4445_v17, %v4440_v16  ;;  %v649_v60 = vld [vmem:[%s648_s9] sm:$0x1]  ;;  %vm828_vm4 = vcmask 253952   ;;  %s827_s20 = scalar_lea.vmem [#allocation6], %s4096_s8  ;;  %s499_s8 = sadd.s32 1, %s4096_s8  }
 0x168   : > { %3533 = vmatprep.subr.bf16.mxu0 %v4148_v51  ;;  %3539 = vmatprep.subr.bf16.mxu1 %v4148_v51  ;;  %p496_p0 = scmp.ge.s32.totalorder %s499_s8, 8  }
 0x169   : > { %3255 = vmatprep.mubr.msk.f32.mxu0 %vm4149_vm3, %v4150_v54  ;;  %3266 = vmatprep.mubr.msk.f32.mxu1 %vm4149_vm3, %v4150_v54  ;;  %v3033_v3 = vld [vmem:[%s4921_s4 + $0x20] sm:$0xff] (%p496_p0)  ;;  %v3034_v4 = vld [vmem:[%s4921_s4 + $0x28] sm:$0xff] (%p496_p0)  ;;  %v847_v5 = vld [vmem:[%s4921_s4 + $0x10] sm:$0xff] (%p496_p0)  ;;  %vm928_vm5 = vcmask (%p496_p0), 64512   ;;  %s4647_s30 = smov (%p496_p0), 0  }
 0x16a   : > { %v722_v26 = vld [vmem:[%s721_s19] sm:$0x1]  ;;  %v3561_v6 = vpack.c.bf16 (%p496_p0), %v3034_v4, %v3033_v3  ;;  %v848_v7 = vld [vmem:[%s4921_s4 + $0x18] sm:$0xff] (%p496_p0)  ;;  %v3035_v8 = vld [vmem:[%s4921_s4 + $0x30] sm:$0xff] (%p496_p0) }
 0x16b   : > { %3535 = vmatpush3.bf16.msra.mxu0 %v3534_v52  ;;  %3541 = vmatpush3.bf16.msra.mxu1 %v3540_v53  ;;  %v795_v23 = vld [vmem:[%s794_s18] sm:$0x1]  ;;  %v4555_v53 = vld [vmem:[#allocation22 + $0x10] sm:$0xff] (%p496_p0)  ;;  %v3036_v9 = vld [vmem:[%s4921_s4 + $0x38] sm:$0xff] (%p496_p0)  ;;  %v3558_v10 = vpack.c.bf16 (%p496_p0), %v848_v7, %v847_v5 }
 0x16c   : > { %3542 = vmatprep.subr.bf16.mxu0 %v4148_v51  ;;  %3548 = vmatprep.subr.bf16.mxu1 %v4148_v51  ;;  %v4553_v52 = vld [vmem:[#allocation22 + $0x8] sm:$0xff] (%p496_p0)  ;;  %v3564_v11 = vpack.c.bf16 (%p496_p0), %v3036_v9, %v3035_v8  ;;  %v3040_v13 = vld [vmem:[%s4921_s4 + $0x48] sm:$0xff] (%p496_p0) }
 0x16d   :  { %v3039_v12 = vld [vmem:[%s4921_s4 + $0x40] sm:$0xff] (%p496_p0)  ;;  %v3046_v15 = vld [vmem:[%s4921_s4 + $0x68] sm:$0xff] (%p496_p0) }
 0x16e   : > { %3256 = vmatmul.mubr.msk.f32.vlgmr.msra.gmra.mrb[0].mxu0 %vm252_vm2, %v4092_v48  ;;  %3267 = vmatmul.mubr.msk.f32.vlgmr.msra.gmra.mrb[0].mxu1 %vm252_vm2, %v4092_v48  ;;  %v3045_v14 = vld [vmem:[%s4921_s4 + $0x60] sm:$0xff] (%p496_p0)  ;;  %v3567_v17 = vpack.c.bf16 (%p496_p0), %v3040_v13, %v3039_v12 }
 0x16f   : > { %3544 = vmatpush3.bf16.msra.mxu0 %v3543_v55  ;;  %3550 = vmatpush3.bf16.msra.mxu1 %v3549_v56  ;;  %v845_v55 = vld [vmem:[%s4921_s4] sm:$0xff] (%p496_p0)  ;;  %v3041_v56 = vld [vmem:[%s4921_s4 + $0x50] sm:$0xff] (%p496_p0) }
 0x170   : > { %3545 = vmatprep.subr.bf16.mxu0 %v4148_v51  ;;  %3551 = vmatprep.subr.bf16.mxu1 %v4148_v51  ;;  %v4551_v51 = vld [vmem:[#allocation22] sm:$0xff] (%p496_p0) }
 0x171   : > { %3277 = vmatprep.mubr.msk.f32.mxu0 %vm4149_vm3, %v4150_v54  ;;  %3288 = vmatprep.mubr.msk.f32.mxu1 %vm4149_vm3, %v4150_v54  ;;  %v4559_v54 = vld [vmem:[#allocation22 + $0x18] sm:$0xff] (%p496_p0) }
 0x173   : > { %3547 = vmatpush3.bf16.msra.mxu0 %v3546_v57  ;;  %3553 = vmatpush3.bf16.msra.mxu1 %v3552_v58  ;;  %v3042_v57 = vld [vmem:[%s4921_s4 + $0x58] sm:$0xff] (%p496_p0)  ;;  %v3047_v58 = vld [vmem:[%s4921_s4 + $0x70] sm:$0xff] (%p496_p0) }
 0x174   :  { %3554 = vmatprep.subr.bf16.mxu0 (%p496_p0), %v4145_v0  ;;  %3560 = vmatprep.subr.bf16.mxu1 (%p496_p0), %v4145_v0 }
 0x176   : > { %3278 = vmatmul.mubr.msk.f32.vlgmr.msra.gmra.mrb[2].mxu0 %vm252_vm2, %v4092_v48  ;;  %3289 = vmatmul.mubr.msk.f32.vlgmr.msra.gmra.mrb[2].mxu1 %vm252_vm2, %v4092_v48 }
 0x177   :  { %3299 = vmatprep.mubr.msk.f32.mxu0 (%p496_p0), %vm4146_vm0, %v4147_v1  ;;  %3310 = vmatprep.mubr.msk.f32.mxu1 (%p496_p0), %vm4146_vm0, %v4147_v1 }
 0x178   :  { %3562 = vmatpush3.bf16.msra.mxu1 (%p496_p0), %v3561_v6 }
 0x179   :  { %3563 = vmatprep.subr.bf16.mxu1 (%p496_p0), %v4145_v0 }
 0x17c   :  { %3565 = vmatpush3.bf16.msra.mxu1 (%p496_p0), %v3564_v11 }
 0x17d   :  { %3572 = vmatprep.subr.bf16.mxu1 (%p496_p0), %v4145_v0 }
 0x241   : > { %v571_v61 = vpop.f32.mrb[0].mxu0  ;;  %v644_v62 = vpop.f32.mrb[0].mxu1 }
 0x242   : > { %v577_v63 = vadd.f32 %v576_v59, %v571_v61  ;;  %v650_v18 = vadd.f32 %v649_v60, %v644_v62  ;;  %v3257_v19 = vpop.f32.mrb[1].mxu0  ;;  %v3268_v20 = vpop.f32.mrb[1].mxu1  ;;  %v3048_v59 = vld [vmem:[%s4921_s4 + $0x78] sm:$0xff] (%p496_p0)  ;;  %v3570_v60 = vpack.c.bf16 (%p496_p0), %v3042_v57, %v3041_v56  ;;  %v3031_v62 = vld [vmem:[%s4923_s6] ss:$0 sm:$0xff] (%p496_p0) }
 0x243   :  { %v3576_v61 = vpack.c.bf16 (%p496_p0), %v3048_v59, %v3047_v58 }
 0x244   : > { %v3024_v21 = vmul.f32 -1.442695, %v577_v63  ;;  %v3025_v22 = vmul.f32 -1.442695, %v650_v18  ;;  %v3037_v63 = vld [vmem:[%s4923_s6 + $0x1] ss:$0 sm:$0xff] (%p496_p0) }
 0x246   : > { %3778 = vpow2.f32 %v3024_v21 }
 0x247   : > { %3780 = vpow2.f32 %v3025_v22 }
 0x249   : > { %v717_v24 = vpop.f32.mrb[2].mxu0  ;;  %v790_v25 = vpop.f32.mrb[2].mxu1 }
 0x24a   : > { %v796_v27 = vadd.f32 %v795_v23, %v790_v25  ;;  %v3279_v28 = vpop.f32.mrb[3].mxu0  ;;  %v3290_v29 = vpop.f32.mrb[3].mxu1  ;;  %v723_v31 = vadd.f32 %v722_v26, %v717_v24  ;;  %v3043_v24 = vld [vmem:[%s4923_s6 + $0x2] ss:$0 sm:$0xff] (%p496_p0)  ;;  %v3049_v25 = vld [vmem:[%s4923_s6 + $0x3] ss:$0 sm:$0xff] (%p496_p0) }
 0x24c   : > { %v3026_v30 = vmul.f32 -1.442695, %v796_v27 }
 0x24e   : > { %3782 = vpow2.f32 %v3026_v30 }
 0x24f   : > { %3784 = vtanh.f32 %v723_v31 }
 0x250   : > { %v3779_v32 = vpop.eup %3778 }
 0x251   : > { %v3781_v33 = vpop.eup %3780  ;;  %v800_v34 = vadd.f32 1.0, %v3779_v32  ;;  %v4643_v32 = vmov (%p496_p0), 0.0  }
 0x252   : > { %v806_v35 = vadd.f32 1.0, %v3781_v33  ;;  %v4645_v33 = vmov (%p496_p0), 0.0  }
 0x253   : > { %3786 = vrcp.f32 %v800_v34 }
 0x254   : > { %3788 = vrcp.f32 %v806_v35 }
 0x258   : > { %v3783_v36 = vpop.eup %3782 }
 0x259   : > { %v3785_v37 = vpop.eup %3784  ;;  %v813_v39 = vadd.f32 1.0, %v3783_v36 }
 0x25b   : > { %3790 = vrcp.f32 %v813_v39 }
 0x25d   : > { %v3787_v38 = vpop.eup %3786 }
 0x25e   : > { %v3789_v40 = vpop.eup %3788  ;;  %v817_v41 = vmul.f32 %v3787_v38, %v3785_v37 }
 0x25f   : > { %v816_v42 = vmul.f32 %v4088_v47, %v3789_v40 }
 0x261   : > { %v818_v47 = vadd.f32 %v817_v41, %v816_v42  }
 0x263   : > { %3792 = vtanh.f32 %v818_v47  ;;  %v3573_v47 = vpack.c.bf16 (%p496_p0), %v3046_v15, %v3045_v14 }
 0x265   : > { %v3791_v43 = vpop.eup %3790 }
 0x26d   : > { %v3793_v44 = vpop.eup %3792 }
 0x26e   : > { %v820_v48 = vmul.f32 %v3793_v44, %v3791_v43  }
 0x270   : > { %v3027_v45 = vmul.f32 -1.442695, %v820_v48  ;;  %v846_v48 = vld [vmem:[%s4921_s4 + $0x8] sm:$0xff] (%p496_p0) }
 0x271   :  { %v3555_v2 = vpack.c.bf16 (%p496_p0), %v846_v48, %v845_v55 }
 0x272   : > { %3794 = vpow2.f32 %v3027_v45 }
 0x273   :  { %3556 = vmatpush3.bf16.msra.mxu0 (%p496_p0), %v3555_v2 }
 0x274   :  { %3557 = vmatprep.subr.bf16.mxu0 (%p496_p0), %v4145_v0 }
 0x277   :  { %3559 = vmatpush3.bf16.msra.mxu0 (%p496_p0), %v3558_v10 }
 0x278   :  { %3566 = vmatprep.subr.bf16.mxu0 (%p496_p0), %v4145_v0 }
 0x27c   : > { %v3795_v46 = vpop.eup %3794 }
 0x27d   : > { %v824_v49 = vadd.f32 1.0, %v3795_v46 }
 0x27f   : > { %3796 = vrcp.f32 %v824_v49 }
 0x284   :  { %498 = sbr.rel (!%p496_p0) target bundleno = 357 (0x165), region = 183 }
 0x289   : > { %v3797_v50 = vpop.eup %3796 }
 0x28a   : > { %829 = vst.msk [vmem:[%s827_s20] sm:$0x1] %vm828_vm4, %v3797_v50 }
 0x291   :  { %v830_v16 = vld [vmem:[#allocation6] sm:$0xff] }
 0x292   :  { %3300 = vmatmul.mubr.msk.f32.vlgmr.msra.gmra.mrb[0].mxu0 %vm252_vm2, %v830_v16  ;;  %3311 = vmatmul.mubr.msk.f32.vlgmr.msra.gmra.mrb[0].mxu1 %vm252_vm2, %v830_v16 }
 0x293   :  { %3568 = vmatpush3.bf16.msra.mxu0 %v3567_v17  ;;  %3574 = vmatpush3.bf16.msra.mxu1 %v3573_v47 }
 0x294   :  { %3569 = vmatprep.subr.bf16.mxu0 %v4145_v0  ;;  %3575 = vmatprep.subr.bf16.mxu1 %v4145_v0 }
 0x295   :  { %3321 = vmatprep.mubr.msk.f32.mxu0 %vm4146_vm0, %v4147_v1  ;;  %3332 = vmatprep.mubr.msk.f32.mxu1 %vm4146_vm0, %v4147_v1 }
 0x297   :  { %3571 = vmatpush3.bf16.msra.mxu0 %v3570_v60  ;;  %3577 = vmatpush3.bf16.msra.mxu1 %v3576_v61 }
 0x29a   :  { %3322 = vmatmul.mubr.msk.f32.vlgmr.msra.gmra.mrb[2].mxu0 %vm252_vm2, %v830_v16  ;;  %3333 = vmatmul.mubr.msk.f32.vlgmr.msra.gmra.mrb[2].mxu1 %vm252_vm2, %v830_v16 }
 0x365   :  { %v924_v18 = vpop.f32.mrb[0].mxu0  ;;  %v1007_v20 = vpop.f32.mrb[0].mxu1 }
 0x366   :  { %v925_v19 = vadd.f32 %v3031_v62, %v924_v18  ;;  %v3301_v21 = vpop.f32.mrb[1].mxu0  ;;  %v1008_v22 = vadd.f32 %v3037_v63, %v1007_v20  ;;  %v3312_v23 = vpop.f32.mrb[1].mxu1 }
 0x368   :  { %929 = vst.msk [vmem:[#allocation7] sm:$0xff] %vm928_vm5, %v925_v19  ;;  %1011 = vst.msk [vmem:[#allocation8] sm:$0xff] %vm928_vm5, %v1008_v22 }
 0x36d   :  { %v1089_v26 = vpop.f32.mrb[2].mxu0  ;;  %v1171_v28 = vpop.f32.mrb[2].mxu1 }
 0x36e   :  { %v1090_v27 = vadd.f32 %v3043_v24, %v1089_v26  ;;  %v3323_v29 = vpop.f32.mrb[3].mxu0  ;;  %v1172_v30 = vadd.f32 %v3049_v25, %v1171_v28  ;;  %v3334_v31 = vpop.f32.mrb[3].mxu1 }
 0x370   :  { %1093 = vst.msk [vmem:[#allocation9] sm:$0xff] %vm928_vm5, %v1090_v27  ;;  %1175 = vst.msk [vmem:[#allocation10] sm:$0xff] %vm928_vm5, %v1172_v30 }
 0x371 LB: > { %v4151_v34 = vmov 0.0   ;;  %vm4152_vm6 = vmmov 0   ;;  %s1257_s6 = scalar_lea.vmem [#allocation7], %s4108_s30  ;;  %s1330_s0 = scalar_lea.vmem [#allocation8], %s4108_s30  ;;  %s4108_s30 = sphi %s4647_s30, %s1181_s30   ;;  %v4104_v33 = vphi %v4645_v33, %v4935_v33   ;;  %v4100_v32 = vphi %v4643_v32, %v1500_v32  }
 0x372   : > { %3335 = vmatprep.subr.mxu0 %v4151_v34  ;;  %3340 = vmatprep.subr.mxu1 %v4151_v34  ;;  %v1258_v35 = vld [vmem:[%s1257_s6] sm:$0x1]  ;;  %s1476_s1 = scalar_lea.vmem [#allocation10], %s4108_s30  ;;  %s1403_s16 = scalar_lea.vmem [#allocation9], %s4108_s30 }
 0x373   : > { %3336 = vmatpush3.msra.mxu0 %v4551_v51  ;;  %3337 = vmatprep.mubr.msk.f32.mxu0 %vm4152_vm6, %v4151_v34  ;;  %v1331_v36 = vld [vmem:[%s1330_s0] sm:$0x1]  ;;  %s1181_s30 = sadd.s32 1, %s4108_s30  }
 0x374   : > { %3341 = vmatpush3.msra.mxu1 %v4553_v52  ;;  %3342 = vmatprep.mubr.msk.f32.mxu1 %vm4152_vm6, %v4151_v34  ;;  %p1178_p1 = scmp.ge.s32.totalorder %s1181_s30, 8  }
 0x375   : > { %3338 = vmatmul.mubr.msk.f32.vlgmr.msra.gmra.mrb[0].mxu0 %vm928_vm5, %v4104_v33  ;;  %3343 = vmatmul.mubr.msk.f32.vlgmr.msra.gmra.mrb[0].mxu1 %vm928_vm5, %v4104_v33  ;;  %v4673_v56 = vld [vmem:[#allocation27] sm:$0xff] (%p1178_p1)  ;;  %v4675_v57 = vld [vmem:[#allocation27 + $0x8] sm:$0xff] (%p1178_p1)  ;;  %v4677_v58 = vld [vmem:[#allocation27 + $0x10] sm:$0xff] (%p1178_p1)  ;;  %s4733_s24 = smov (%p1178_p1), 0  }
 0x376   : > { %3345 = vmatprep.subr.mxu0 %v4151_v34  ;;  %3350 = vmatprep.subr.mxu1 %v4151_v34  ;;  %v4681_v59 = vld [vmem:[#allocation27 + $0x18] sm:$0xff] (%p1178_p1)  ;;  %v4683_v60 = vld [vmem:[#allocation27 + $0x20] sm:$0xff] (%p1178_p1)  ;;  %v4685_v61 = vld [vmem:[#allocation27 + $0x28] sm:$0xff] (%p1178_p1) }
 0x377   : > { %3346 = vmatpush3.msra.mxu0 %v4555_v53  ;;  %3351 = vmatpush3.msra.mxu1 %v4559_v54  ;;  %v1477_v49 = vld [vmem:[%s1476_s1] sm:$0x1]  ;;  %v4691_v51 = vld [vmem:[#allocation27 + $0x30] sm:$0xff] (%p1178_p1)  ;;  %v4693_v52 = vld [vmem:[#allocation27 + $0x38] sm:$0xff] (%p1178_p1) }
 0x378   : > { %3347 = vmatprep.mubr.msk.f32.mxu0 %vm4152_vm6, %v4151_v34  ;;  %3352 = vmatprep.mubr.msk.f32.mxu1 %vm4152_vm6, %v4151_v34  ;;  %v1404_v2 = vld [vmem:[%s1403_s16] sm:$0x1]  ;;  %v4695_v53 = vld [vmem:[#allocation27 + $0x40] sm:$0xff] (%p1178_p1)  ;;  %v4699_v62 = vld [vmem:[#allocation27 + $0x50] sm:$0xff] (%p1178_p1) }
 0x379   : > { %3348 = vmatmul.mubr.msk.f32.vlgmr.msra.gmra.mrb[2].mxu0 %vm928_vm5, %v4104_v33  ;;  %3353 = vmatmul.mubr.msk.f32.vlgmr.msra.gmra.mrb[2].mxu1 %vm928_vm5, %v4104_v33  ;;  %v4697_v54 = vld [vmem:[#allocation27 + $0x48] sm:$0xff] (%p1178_p1)  ;;  %v4701_v63 = vld [vmem:[#allocation27 + $0x58] sm:$0xff] (%p1178_p1)  ;;  %v4703_v18 = vld [vmem:[#allocation27 + $0x60] sm:$0xff] (%p1178_p1) }
 0x37a   :  { %3355 = vmatprep.subr.mxu0 (%p1178_p1), %v4147_v1  ;;  %3360 = vmatprep.subr.mxu1 (%p1178_p1), %v4147_v1  ;;  %v4705_v19 = vld [vmem:[#allocation27 + $0x68] sm:$0xff] (%p1178_p1)  ;;  %v4707_v20 = vld [vmem:[#allocation27 + $0x70] sm:$0xff] (%p1178_p1)  ;;  %v4709_v21 = vld [vmem:[#allocation27 + $0x78] sm:$0xff] (%p1178_p1) }
 0x37b   :  { %3357 = vmatprep.mubr.msk.f32.mxu0 (%p1178_p1), %vm4146_vm0, %v4147_v1  ;;  %3362 = vmatprep.mubr.msk.f32.mxu1 (%p1178_p1), %vm4146_vm0, %v4147_v1  ;;  %v1530_v22 = vld [vmem:[#allocation25] sm:$0xff] (%p1178_p1)  ;;  %v1605_v23 = vld [vmem:[#allocation25 + $0x8] sm:$0xff] (%p1178_p1)  ;;  %v1677_v24 = vld [vmem:[#allocation25 + $0x10] sm:$0xff] (%p1178_p1) }
 0x37c   :  { %3356 = vmatpush3.msra.mxu0 (%p1178_p1), %v1530_v22  ;;  %3361 = vmatpush3.msra.mxu1 (%p1178_p1), %v1605_v23  ;;  %v1749_v25 = vld [vmem:[#allocation25 + $0x18] sm:$0xff] (%p1178_p1)  ;;  %v1523_v27 = vld [vmem:[#allocation28] sm:$0x1] (%p1178_p1)  ;;  %v1525_v28 = vld [vmem:[#allocation28 + $0x1] sm:$0x1] (%p1178_p1) }
 0x37d   :  { %3365 = vmatprep.subr.mxu0 (%p1178_p1), %v4147_v1  ;;  %3370 = vmatprep.subr.mxu1 (%p1178_p1), %v4147_v1 }
 0x448   : > { %v1253_v37 = vpop.f32.mrb[0].mxu0  ;;  %v1326_v38 = vpop.f32.mrb[0].mxu1 }
 0x449   : > { %v1259_v39 = vadd.f32 %v1258_v35, %v1253_v37  ;;  %v1332_v40 = vadd.f32 %v1331_v36, %v1326_v38  ;;  %v3339_v41 = vpop.f32.mrb[1].mxu0  ;;  %v3344_v42 = vpop.f32.mrb[1].mxu1  ;;  %v1527_v35 = vld [vmem:[#allocation28 + $0x2] sm:$0x1] (%p1178_p1)  ;;  %v1529_v36 = vld [vmem:[#allocation28 + $0x3] sm:$0x1] (%p1178_p1) }
 0x44b   : > { %v3055_v43 = vmul.f32 -1.442695, %v1259_v39  ;;  %v3056_v44 = vmul.f32 -1.442695, %v1332_v40 }
 0x44c   : > { %v1399_v45 = vpop.f32.mrb[2].mxu0  ;;  %v1472_v46 = vpop.f32.mrb[2].mxu1 }
 0x44d   : > { %3798 = vpow2.f32 %v3055_v43  ;;  %v3349_v50 = vpop.f32.mrb[3].mxu0  ;;  %v3354_v55 = vpop.f32.mrb[3].mxu1  ;;  %v1478_v48 = vadd.f32 %v1477_v49, %v1472_v46  ;;  %v1405_v4 = vadd.f32 %v1404_v2, %v1399_v45  ;;  %v4729_v43 = vmov (%p1178_p1), 0.0  }
 0x44e   : > { %3800 = vpow2.f32 %v3056_v44  ;;  %v4731_v44 = vmov (%p1178_p1), 0.0  }
 0x44f   : > { %v3057_v3 = vmul.f32 -1.442695, %v1478_v48 }
 0x451   : > { %3802 = vpow2.f32 %v3057_v3 }
 0x452   : > { %3804 = vtanh.f32 %v1405_v4 }
 0x457   : > { %v3799_v5 = vpop.eup %3798 }
 0x458   : > { %v3801_v6 = vpop.eup %3800  ;;  %v1482_v7 = vadd.f32 1.0, %v3799_v5 }
 0x459   : > { %v1488_v8 = vadd.f32 1.0, %v3801_v6 }
 0x45a   : > { %3806 = vrcp.f32 %v1482_v7 }
 0x45b   : > { %3808 = vrcp.f32 %v1488_v8  ;;  %v3803_v9 = vpop.eup %3802 }
 0x45c   : > { %v3805_v10 = vpop.eup %3804  ;;  %v1495_v12 = vadd.f32 1.0, %v3803_v9 }
 0x45e   : > { %3810 = vrcp.f32 %v1495_v12 }
 0x464   : > { %v3807_v11 = vpop.eup %3806 }
 0x465   : > { %v3809_v13 = vpop.eup %3808  ;;  %v1499_v14 = vmul.f32 %v3807_v11, %v3805_v10 }
 0x466   : > { %v1498_v15 = vmul.f32 %v4100_v32, %v3809_v13 }
 0x468   : > { %v1500_v32 = vadd.f32 %v1499_v14, %v1498_v15   ;;  %v3811_v16 = vpop.eup %3810 }
 0x46a   : > { %3812 = vtanh.f32 %v1500_v32 }
 0x471   :  { %1180 = sbr.rel (!%p1178_p1) target bundleno = 881 (0x371), region = 194 }
 0x474   : > { %v3813_v17 = vpop.eup %3812 }
 0x475   : > { %v1502_v47 = vmul.f32 %v3813_v17, %v3811_v16  }
 0x477   : > { %v4935_v33 = vmov %v1502_v47  ;;  %3814 = vtanh.f32 (%p1178_p1), %v1502_v47 }
 0x481   :  { %v3815_v26 = vpop.eup %3814 }
 0x482   :  { %3358 = vmatmul.mubr.msk.f32.vlgmr.msra.gmra.mrb[0].mxu0 %vm928_vm5, %v3815_v26  ;;  %3363 = vmatmul.mubr.msk.f32.vlgmr.msra.gmra.mrb[0].mxu1 %vm928_vm5, %v3815_v26 }
 0x483   :  { %3366 = vmatpush3.msra.mxu0 %v1677_v24  ;;  %3371 = vmatpush3.msra.mxu1 %v1749_v25 }
 0x484   :  { %3367 = vmatprep.mubr.msk.f32.mxu0 %vm4146_vm0, %v4147_v1  ;;  %3372 = vmatprep.mubr.msk.f32.mxu1 %vm4146_vm0, %v4147_v1 }
 0x486   :  { %3368 = vmatmul.mubr.msk.f32.vlgmr.msra.gmra.mrb[2].mxu0 %vm928_vm5, %v3815_v26  ;;  %3373 = vmatmul.mubr.msk.f32.vlgmr.msra.gmra.mrb[2].mxu1 %vm928_vm5, %v3815_v26 }
 0x555   :  { %v1600_v29 = vpop.f32.mrb[0].mxu0  ;;  %v1672_v30 = vpop.f32.mrb[0].mxu1 }
 0x556   :  { %v4721_v31 = vadd.f32 %v1600_v29, %v1523_v27  ;;  %v4723_v32 = vadd.f32 %v1672_v30, %v1525_v28  ;;  %v3359_v33 = vpop.f32.mrb[1].mxu0  ;;  %v3364_v34 = vpop.f32.mrb[1].mxu1 }
 0x559   :  { %v1744_v37 = vpop.f32.mrb[2].mxu0  ;;  %v1816_v38 = vpop.f32.mrb[2].mxu1 }
 0x55a   :  { %v4725_v39 = vadd.f32 %v1744_v37, %v1527_v35  ;;  %v4727_v40 = vadd.f32 %v1816_v38, %v1529_v36  ;;  %v3369_v41 = vpop.f32.mrb[3].mxu0  ;;  %v3374_v42 = vpop.f32.mrb[3].mxu1 }
 0x55b LB: > { %v3579_v45 = vpack.c.bf16 %v4675_v57, %v4673_v56  ;;  %v3585_v46 = vpack.c.bf16 %v4685_v61, %v4683_v60  ;;  %v4153_v49 = vmov 0.0|0.0   ;;  %v3582_v50 = vpack.c.bf16 %v4681_v59, %v4677_v58  ;;  %s2145_s27 = scalar_lea.vmem [#allocation16], %s4120_s24  ;;  %s1825_s24 = sadd.s32 1, %s4120_s24   ;;  %s4120_s24 = sphi %s4733_s24, %s1825_s24   ;;  %v4116_v44 = vphi %v4731_v44, %v2138_v44   ;;  %v4112_v43 = vphi %v4729_v43, %v2136_v43  }
 0x55c   : > { %3578 = vmatprep.subr.bf16.mxu0 %v4153_v49  ;;  %3584 = vmatprep.subr.bf16.mxu1 %v4153_v49  ;;  %v3588_v55 = vpack.c.bf16 %v4693_v52, %v4691_v51  ;;  %vm4154_vm7 = vmmov 0   ;;  %v4155_v48 = vmov 0.0   ;;  %v3591_v2 = vpack.c.bf16 %v4697_v54, %v4695_v53  ;;  %p1822_p2 = scmp.ge.s32.totalorder %s1825_s24, 8  }
 0x55d   : > { %3580 = vmatpush3.bf16.msra.mxu0 %v3579_v45  ;;  %3586 = vmatpush3.bf16.msra.mxu1 %v3585_v46  ;;  %v3597_v3 = vpack.c.bf16 %v4705_v19, %v4703_v18  ;;  %v3594_v4 = vpack.c.bf16 %v4701_v63, %v4699_v62  ;;  %v3600_v5 = vpack.c.bf16 %v4709_v21, %v4707_v20  ;;  %v4798_v56 = vld [vmem:[#allocation31 + $0x30] sm:$0xff] (%p1822_p2)  ;;  %v4800_v57 = vld [vmem:[#allocation31 + $0x38] sm:$0xff] (%p1822_p2)  ;;  %v4802_v58 = vld [vmem:[#allocation31 + $0x40] sm:$0xff] (%p1822_p2)  ;;  %s4840_s29 = smov (%p1822_p2), 0  }
 0x55e   : > { %3581 = vmatprep.subr.bf16.mxu0 %v4153_v49  ;;  %3587 = vmatprep.subr.bf16.mxu1 %v4153_v49  ;;  %v4804_v59 = vld [vmem:[#allocation31 + $0x48] sm:$0xff] (%p1822_p2)  ;;  %v4806_v60 = vld [vmem:[#allocation31 + $0x50] sm:$0xff] (%p1822_p2)  ;;  %v4808_v61 = vld [vmem:[#allocation31 + $0x58] sm:$0xff] (%p1822_p2) }
 0x55f   : > { %3383 = vmatprep.mubr.msk.f32.mxu0 %vm4154_vm7, %v4155_v48  ;;  %3394 = vmatprep.mubr.msk.f32.mxu1 %vm4154_vm7, %v4155_v48  ;;  %v4810_v51 = vld [vmem:[#allocation31 + $0x60] sm:$0xff] (%p1822_p2)  ;;  %v4812_v52 = vld [vmem:[#allocation31 + $0x68] sm:$0xff] (%p1822_p2)  ;;  %v4814_v53 = vld [vmem:[#allocation31 + $0x70] sm:$0xff] (%p1822_p2) }
 0x560   :  { %v4816_v54 = vld [vmem:[#allocation31 + $0x78] sm:$0xff] (%p1822_p2)  ;;  %v2175_v62 = vld [vmem:[#allocation30] sm:$0xff] (%p1822_p2)  ;;  %v2176_v63 = vld [vmem:[#allocation30 + $0x8] sm:$0xff] (%p1822_p2) }
 0x561   : > { %3583 = vmatpush3.bf16.msra.mxu0 %v3582_v50  ;;  %3589 = vmatpush3.bf16.msra.mxu1 %v3588_v55  ;;  %v4782_v50 = vld [vmem:[#allocation31 + $0x8] sm:$0xff] (%p1822_p2)  ;;  %v4784_v55 = vld [vmem:[#allocation31 + $0x10] sm:$0xff] (%p1822_p2)  ;;  %v3603_v18 = vpack.c.bf16 (%p1822_p2), %v2176_v63, %v2175_v62  ;;  %v2260_v19 = vld [vmem:[#allocation30 + $0x20] sm:$0xff] (%p1822_p2) }
 0x562   : > { %3590 = vmatprep.subr.bf16.mxu0 %v4153_v49  ;;  %3596 = vmatprep.subr.bf16.mxu1 %v4153_v49  ;;  %v2261_v20 = vld [vmem:[#allocation30 + $0x28] sm:$0xff] (%p1822_p2)  ;;  %v2177_v21 = vld [vmem:[#allocation30 + $0x10] sm:$0xff] (%p1822_p2) }
 0x564   : > { %3384 = vmatmul.mubr.msk.f32.vlgmr.msra.gmra.mrb[0].mxu0 %vm252_vm2, %v4116_v44  ;;  %3395 = vmatmul.mubr.msk.f32.vlgmr.msra.gmra.mrb[0].mxu1 %vm252_vm2, %v4116_v44 }
 0x565   : > { %3592 = vmatpush3.bf16.msra.mxu0 %v3591_v2  ;;  %3598 = vmatpush3.bf16.msra.mxu1 %v3597_v3  ;;  %v4790_v2 = vld [vmem:[#allocation31 + $0x20] sm:$0xff] (%p1822_p2)  ;;  %v4792_v3 = vld [vmem:[#allocation31 + $0x28] sm:$0xff] (%p1822_p2) }
 0x566   : > { %3593 = vmatprep.subr.bf16.mxu0 %v4153_v49  ;;  %3599 = vmatprep.subr.bf16.mxu1 %v4153_v49  ;;  %v4780_v49 = vld [vmem:[#allocation31] sm:$0xff] (%p1822_p2) }
 0x567   : > { %3405 = vmatprep.mubr.msk.f32.mxu0 %vm4154_vm7, %v4155_v48  ;;  %3416 = vmatprep.mubr.msk.f32.mxu1 %vm4154_vm7, %v4155_v48  ;;  %v4788_v48 = vld [vmem:[#allocation31 + $0x18] sm:$0xff] (%p1822_p2) }
 0x569   : > { %3595 = vmatpush3.bf16.msra.mxu0 %v3594_v4  ;;  %3601 = vmatpush3.bf16.msra.mxu1 %v3600_v5  ;;  %v2342_v4 = vld [vmem:[#allocation30 + $0x40] sm:$0xff] (%p1822_p2)  ;;  %v2343_v5 = vld [vmem:[#allocation30 + $0x48] sm:$0xff] (%p1822_p2) }
 0x56a   :  { %3602 = vmatprep.subr.bf16.mxu0 (%p1822_p2), %v4145_v0  ;;  %3608 = vmatprep.subr.bf16.mxu1 (%p1822_p2), %v4145_v0 }
 0x56c   : > { %3406 = vmatmul.mubr.msk.f32.vlgmr.msra.gmra.mrb[2].mxu0 %vm252_vm2, %v4116_v44  ;;  %3417 = vmatmul.mubr.msk.f32.vlgmr.msra.gmra.mrb[2].mxu1 %vm252_vm2, %v4116_v44 }
 0x56d   :  { %3427 = vmatprep.mubr.msk.f32.mxu0 (%p1822_p2), %vm4146_vm0, %v4147_v1  ;;  %3438 = vmatprep.mubr.msk.f32.mxu1 (%p1822_p2), %vm4146_vm0, %v4147_v1 }
 0x56e   :  { %3604 = vmatpush3.bf16.msra.mxu0 (%p1822_p2), %v3603_v18 }
 0x56f   :  { %3605 = vmatprep.subr.bf16.mxu0 (%p1822_p2), %v4145_v0 }
 0x637   : > { %v1897_v6 = vpop.f32.mrb[0].mxu0  ;;  %v1968_v7 = vpop.f32.mrb[0].mxu1 }
 0x638   : > { %v1901_v8 = vadd.f32 %v1897_v6, %v4721_v31  ;;  %v1972_v9 = vadd.f32 %v1968_v7, %v4723_v32  ;;  %v3385_v10 = vpop.f32.mrb[1].mxu0  ;;  %v3396_v11 = vpop.f32.mrb[1].mxu1  ;;  %v3609_v31 = vpack.c.bf16 (%p1822_p2), %v2261_v20, %v2260_v19  ;;  %v2178_v32 = vld [vmem:[#allocation30 + $0x18] sm:$0xff] (%p1822_p2)  ;;  %v2424_v6 = vld [vmem:[#allocation30 + $0x60] sm:$0xff] (%p1822_p2)  ;;  %v2425_v7 = vld [vmem:[#allocation30 + $0x68] sm:$0xff] (%p1822_p2) }
 0x639   :  { %v3621_v10 = vpack.c.bf16 (%p1822_p2), %v2425_v7, %v2424_v6  ;;  %v2344_v11 = vld [vmem:[#allocation30 + $0x50] sm:$0xff] (%p1822_p2) }
 0x63a   : > { %v3066_v12 = vmul.f32 -1.442695, %v1901_v8  ;;  %v3067_v13 = vmul.f32 -1.442695, %v1972_v9  ;;  %3610 = vmatpush3.bf16.msra.mxu1 (%p1822_p2), %v3609_v31  ;;  %v3615_v9 = vpack.c.bf16 (%p1822_p2), %v2343_v5, %v2342_v4 }
 0x63b   :  { %3611 = vmatprep.subr.bf16.mxu1 (%p1822_p2), %v4145_v0 }
 0x63c   : > { %3816 = vpow2.f32 %v3066_v12  ;;  %v2345_v12 = vld [vmem:[#allocation30 + $0x58] sm:$0xff] (%p1822_p2) }
 0x63d   : > { %3818 = vpow2.f32 %v3067_v13  ;;  %v2426_v13 = vld [vmem:[#allocation30 + $0x70] sm:$0xff] (%p1822_p2) }
 0x63f   : > { %v2039_v14 = vpop.f32.mrb[2].mxu0  ;;  %v2110_v15 = vpop.f32.mrb[2].mxu1 }
 0x640   : > { %v2114_v16 = vadd.f32 %v2110_v15, %v4727_v40  ;;  %v3407_v17 = vpop.f32.mrb[3].mxu0  ;;  %v3418_v47 = vpop.f32.mrb[3].mxu1  ;;  %v2043_v23 = vadd.f32 %v2039_v14, %v4725_v39  ;;  %v2262_v39 = vld [vmem:[#allocation30 + $0x30] sm:$0xff] (%p1822_p2)  ;;  %v2263_v40 = vld [vmem:[#allocation30 + $0x38] sm:$0xff] (%p1822_p2)  ;;  %v3618_v15 = vpack.c.bf16 (%p1822_p2), %v2345_v12, %v2344_v11 }
 0x641   :  { %v2427_v14 = vld [vmem:[#allocation30 + $0x78] sm:$0xff] (%p1822_p2)  ;;  %v3070_v17 = vld [vmem:[#allocation33] ss:$0 sm:$0xff] (%p1822_p2)  ;;  %v3072_v47 = vld [vmem:[#allocation33 + $0x1] ss:$0 sm:$0xff] (%p1822_p2) }
 0x642   : > { %v3068_v22 = vmul.f32 -1.442695, %v2114_v16  ;;  %v3624_v16 = vpack.c.bf16 (%p1822_p2), %v2427_v14, %v2426_v13 }
 0x644   : > { %3820 = vpow2.f32 %v3068_v22 }
 0x645   : > { %3822 = vtanh.f32 %v2043_v23 }
 0x646   : > { %v3817_v24 = vpop.eup %3816 }
 0x647   : > { %v3819_v25 = vpop.eup %3818  ;;  %v2118_v26 = vadd.f32 1.0, %v3817_v24 }
 0x648   : > { %v2124_v27 = vadd.f32 1.0, %v3819_v25 }
 0x649   : > { %3824 = vrcp.f32 %v2118_v26 }
 0x64a   : > { %3826 = vrcp.f32 %v2124_v27 }
 0x64e   : > { %v3821_v28 = vpop.eup %3820 }
 0x64f   : > { %v3823_v29 = vpop.eup %3822  ;;  %v2131_v33 = vadd.f32 1.0, %v3821_v28  ;;  %v3074_v28 = vld [vmem:[#allocation33 + $0x2] ss:$0 sm:$0xff] (%p1822_p2) }
 0x651   : > { %3828 = vrcp.f32 %v2131_v33 }
 0x653   : > { %v3825_v30 = vpop.eup %3824 }
 0x654   : > { %v3827_v34 = vpop.eup %3826  ;;  %v2135_v35 = vmul.f32 %v3825_v30, %v3823_v29  ;;  %v3076_v29 = vld [vmem:[#allocation33 + $0x3] ss:$0 sm:$0xff] (%p1822_p2) }
 0x655   : > { %v2134_v36 = vmul.f32 %v4112_v43, %v3827_v34 }
 0x657   : > { %v2136_v43 = vadd.f32 %v2135_v35, %v2134_v36  }
 0x659   : > { %3830 = vtanh.f32 %v2136_v43  ;;  %v3606_v43 = vpack.c.bf16 (%p1822_p2), %v2178_v32, %v2177_v21 }
 0x65b   : > { %v3829_v37 = vpop.eup %3828  ;;  %3607 = vmatpush3.bf16.msra.mxu0 (%p1822_p2), %v3606_v43 }
 0x65c   :  { %3614 = vmatprep.subr.bf16.mxu0 (%p1822_p2), %v4145_v0 }
 0x663   : > { %v3831_v38 = vpop.eup %3830 }
 0x664   : > { %v2138_v44 = vmul.f32 %v3831_v38, %v3829_v37   ;;  %v4836_v38 = vmov (%p1822_p2), 0.0  }
 0x666   : > { %v3069_v41 = vmul.f32 -1.442695, %v2138_v44  ;;  %v3612_v44 = vpack.c.bf16 (%p1822_p2), %v2263_v40, %v2262_v39 }
 0x668   : > { %3832 = vpow2.f32 %v3069_v41  ;;  %3613 = vmatpush3.bf16.msra.mxu1 (%p1822_p2), %v3612_v44  ;;  %v4838_v41 = vmov (%p1822_p2), 0.0  }
 0x669   :  { %3620 = vmatprep.subr.bf16.mxu1 (%p1822_p2), %v4145_v0 }
 0x672   : > { %v3833_v42 = vpop.eup %3832 }
 0x673   : > { %v2142_v45 = vadd.f32 1.0, %v3833_v42 }
 0x675   : > { %3834 = vrcp.f32 %v2142_v45 }
 0x67a   :  { %1824 = sbr.rel (!%p1822_p2) target bundleno = 1371 (0x55b), region = 205 }
 0x67f   : > { %v3835_v46 = vpop.eup %3834 }
 0x680   : > { %2147 = vst.msk [vmem:[%s2145_s27] sm:$0x1] %vm828_vm4, %v3835_v46 }
 0x687   :  { %v2148_v8 = vld [vmem:[#allocation16] sm:$0xff] }
 0x688   :  { %3428 = vmatmul.mubr.msk.f32.vlgmr.msra.gmra.mrb[0].mxu0 %vm252_vm2, %v2148_v8  ;;  %3439 = vmatmul.mubr.msk.f32.vlgmr.msra.gmra.mrb[0].mxu1 %vm252_vm2, %v2148_v8 }
 0x689   :  { %3616 = vmatpush3.bf16.msra.mxu0 %v3615_v9  ;;  %3622 = vmatpush3.bf16.msra.mxu1 %v3621_v10 }
 0x68a   :  { %3617 = vmatprep.subr.bf16.mxu0 %v4145_v0  ;;  %3623 = vmatprep.subr.bf16.mxu1 %v4145_v0 }
 0x68b   :  { %3449 = vmatprep.mubr.msk.f32.mxu0 %vm4146_vm0, %v4147_v1  ;;  %3460 = vmatprep.mubr.msk.f32.mxu1 %vm4146_vm0, %v4147_v1 }
 0x68d   :  { %3619 = vmatpush3.bf16.msra.mxu0 %v3618_v15  ;;  %3625 = vmatpush3.bf16.msra.mxu1 %v3624_v16 }
 0x690   :  { %3450 = vmatmul.mubr.msk.f32.vlgmr.msra.gmra.mrb[2].mxu0 %vm252_vm2, %v2148_v8  ;;  %3461 = vmatmul.mubr.msk.f32.vlgmr.msra.gmra.mrb[2].mxu1 %vm252_vm2, %v2148_v8 }
 0x75b   :  { %v2254_v22 = vpop.f32.mrb[0].mxu0  ;;  %v2336_v24 = vpop.f32.mrb[0].mxu1 }
 0x75c   :  { %v2255_v23 = vadd.f32 %v3070_v17, %v2254_v22  ;;  %v3429_v25 = vpop.f32.mrb[1].mxu0  ;;  %v2337_v26 = vadd.f32 %v3072_v47, %v2336_v24  ;;  %v3440_v27 = vpop.f32.mrb[1].mxu1 }
 0x75e   :  { %2258 = vst.msk [vmem:[#allocation17] sm:$0xff] %vm252_vm2, %v2255_v23  ;;  %2340 = vst.msk [vmem:[#allocation18] sm:$0xff] %vm252_vm2, %v2337_v26 }
 0x763   :  { %v2418_v30 = vpop.f32.mrb[2].mxu0  ;;  %v2500_v34 = vpop.f32.mrb[2].mxu1 }
 0x764   :  { %v2419_v33 = vadd.f32 %v3074_v28, %v2418_v30  ;;  %v3451_v35 = vpop.f32.mrb[3].mxu0  ;;  %v2501_v36 = vadd.f32 %v3076_v29, %v2500_v34  ;;  %v3462_v37 = vpop.f32.mrb[3].mxu1 }
 0x766   :  { %2422 = vst.msk [vmem:[#allocation19] sm:$0xff] %vm252_vm2, %v2419_v33  ;;  %2504 = vst.msk [vmem:[#allocation20] sm:$0xff] %vm252_vm2, %v2501_v36 }
 0x767 LB: > { %v3627_v42 = vpack.c.bf16 %v4782_v50, %v4780_v49  ;;  %v3633_v45 = vpack.c.bf16 %v4792_v3, %v4790_v2  ;;  %v4156_v46 = vmov 0.0|0.0   ;;  %v3630_v62 = vpack.c.bf16 %v4788_v48, %v4784_v55  ;;  %s2586_s25 = scalar_lea.vmem [#allocation17], %s4132_s29  ;;  %s2659_s17 = scalar_lea.vmem [#allocation18], %s4132_s29  ;;  %s4132_s29 = sphi %s4840_s29, %s2510_s29   ;;  %v4128_v41 = vphi %v4838_v41, %v2831_v41   ;;  %v4124_v38 = vphi %v4836_v38, %v2829_v38  }
 0x768   : > { %3626 = vmatprep.subr.bf16.mxu0 %v4156_v46  ;;  %3632 = vmatprep.subr.bf16.mxu1 %v4156_v46  ;;  %v3636_v63 = vpack.c.bf16 %v4800_v57, %v4798_v56  ;;  %vm4157_vm8 = vmmov 0   ;;  %v4158_v18 = vmov 0.0   ;;  %v3639_v19 = vpack.c.bf16 %v4804_v59, %v4802_v58  ;;  %v2587_v32 = vld [vmem:[%s2586_s25] sm:$0x1]  ;;  %s2805_s8 = scalar_lea.vmem [#allocation20], %s4132_s29  ;;  %s2732_s3 = scalar_lea.vmem [#allocation19], %s4132_s29 }
 0x769   : > { %3628 = vmatpush3.bf16.msra.mxu0 %v3627_v42  ;;  %3634 = vmatpush3.bf16.msra.mxu1 %v3633_v45  ;;  %v3645_v20 = vpack.c.bf16 %v4812_v52, %v4810_v51  ;;  %v3642_v21 = vpack.c.bf16 %v4808_v61, %v4806_v60  ;;  %v3648_v31 = vpack.c.bf16 %v4816_v54, %v4814_v53  ;;  %v2660_v39 = vld [vmem:[%s2659_s17] sm:$0x1]  ;;  %s2832_s9 = scalar_lea.vmem [#allocation21], %s4132_s29  ;;  %s2510_s29 = sadd.s32 1, %s4132_s29  }
 0x76a   : > { %3629 = vmatprep.subr.bf16.mxu0 %v4156_v46  ;;  %3635 = vmatprep.subr.bf16.mxu1 %v4156_v46  ;;  %p2507_p3 = scmp.ge.s32.totalorder %s2510_s29, 8  }
 0x76b   : > { %3471 = vmatprep.mubr.msk.f32.mxu0 %vm4157_vm8, %v4158_v18  ;;  %3482 = vmatprep.mubr.msk.f32.mxu1 %vm4157_vm8, %v4158_v18  ;;  %v2836_v36 = vld [vmem:[%s4930_s13] sm:$0xff] (%p2507_p3)  ;;  %v2837_v37 = vld [vmem:[%s4930_s13 + $0x8] sm:$0xff] (%p2507_p3)  ;;  %v2838_v42 = vld [vmem:[%s4930_s13 + $0x10] sm:$0xff] (%p2507_p3)  ;;  %s4159_s4 = smov (%p2507_p3), [#allocation34]  }
 0x76c   :  { %v2839_v49 = vld [vmem:[%s4930_s13 + $0x18] sm:$0xff] (%p2507_p3)  ;;  %s2920_s28 = sshll.u32 (%p2507_p3), %s4159_s4, 4  ;;  %s2921_s28 = int_to_ptr.vmem [resolvable:$true] %s2920_s28 }
 0x76d   : > { %3631 = vmatpush3.bf16.msra.mxu0 %v3630_v62  ;;  %3637 = vmatpush3.bf16.msra.mxu1 %v3636_v63  ;;  %v2806_v9 = vld [vmem:[%s2805_s8] sm:$0x1]  ;;  %v3654_v50 = vpack.c.bf16 (%p2507_p3), %v2839_v49, %v2838_v42  ;;  %s4006_s22 = scalar_lea.vmem (%p2507_p3), %s2921_s28, 128  ;;  %p4011_p5 = scmp.lt.s32.totalorder (%p2507_p3), %s2921_s28, %s2921_s28 }
 0x76e   : > { %3638 = vmatprep.subr.bf16.mxu0 %v4156_v46  ;;  %3644 = vmatprep.subr.bf16.mxu1 %v4156_v46  ;;  %v2733_v12 = vld [vmem:[%s2732_s3] sm:$0x1]  ;;  %p4007_p4 = scmp.ne.s32.totalorder (%p2507_p3), %s2921_s28, %s4006_s22  ;;  %p4012_p6 = scmp.lt.s32.totalorder (%p2507_p3), %s4006_s22, %s4006_s22 }
 0x770   : > { %3472 = vmatmul.mubr.msk.f32.vlgmr.msra.gmra.mrb[0].mxu0 %vm252_vm2, %v4128_v41  ;;  %3483 = vmatmul.mubr.msk.f32.vlgmr.msra.gmra.mrb[0].mxu1 %vm252_vm2, %v4128_v41  ;;  %p4013_p7 = por (%p2507_p3), %p4012_p6, %p4011_p5 }
 0x771   : > { %3640 = vmatpush3.bf16.msra.mxu0 %v3639_v19  ;;  %3646 = vmatpush3.bf16.msra.mxu1 %v3645_v20 }
 0x772   : > { %3641 = vmatprep.subr.bf16.mxu0 %v4156_v46  ;;  %3647 = vmatprep.subr.bf16.mxu1 %v4156_v46  ;;  %p4014_p8 = pnand (%p2507_p3), %p4013_p7, %p4007_p4 }
 0x773   : > { %3493 = vmatprep.mubr.msk.f32.mxu0 %vm4157_vm8, %v4158_v18  ;;  %3504 = vmatprep.mubr.msk.f32.mxu1 %vm4157_vm8, %v4158_v18 }
 0x775   : > { %3643 = vmatpush3.bf16.msra.mxu0 %v3642_v21  ;;  %3649 = vmatpush3.bf16.msra.mxu1 %v3648_v31 }
 0x776   :  { %3650 = vmatprep.subr.bf16.mxu0 (%p2507_p3), %v4145_v0 }
 0x778   : > { %3494 = vmatmul.mubr.msk.f32.vlgmr.msra.gmra.mrb[2].mxu0 %vm252_vm2, %v4128_v41  ;;  %3505 = vmatmul.mubr.msk.f32.vlgmr.msra.gmra.mrb[2].mxu1 %vm252_vm2, %v4128_v41 }
 0x779   :  { %3515 = vmatprep.mubr.msk.f32.mxu0 (%p2507_p3), %vm4146_vm0, %v4147_v1 }
 0x843   : > { %v2582_v40 = vpop.f32.mrb[0].mxu0  ;;  %v2655_v43 = vpop.f32.mrb[0].mxu1 }
 0x844   : > { %v2588_v44 = vadd.f32 %v2587_v32, %v2582_v40  ;;  %v2661_v4 = vadd.f32 %v2660_v39, %v2655_v43  ;;  %v3473_v5 = vpop.f32.mrb[1].mxu0  ;;  %v3484_v6 = vpop.f32.mrb[1].mxu1 }
 0x846   : > { %v3082_v7 = vmul.f32 -1.442695, %v2588_v44  ;;  %v3083_v8 = vmul.f32 -1.442695, %v2661_v4 }
 0x848   : > { %3836 = vpow2.f32 %v3082_v7 }
 0x849   : > { %3838 = vpow2.f32 %v3083_v8 }
 0x84b   : > { %v2728_v10 = vpop.f32.mrb[2].mxu0  ;;  %v2801_v11 = vpop.f32.mrb[2].mxu1 }
 0x84c   : > { %v2807_v13 = vadd.f32 %v2806_v9, %v2801_v11  ;;  %v3495_v14 = vpop.f32.mrb[3].mxu0  ;;  %v3506_v15 = vpop.f32.mrb[3].mxu1  ;;  %v2734_v17 = vadd.f32 %v2733_v12, %v2728_v10 }
 0x84e   : > { %v3084_v16 = vmul.f32 -1.442695, %v2807_v13 }
 0x850   : > { %3840 = vpow2.f32 %v3084_v16 }
 0x851   : > { %3842 = vtanh.f32 %v2734_v17 }
 0x852   : > { %v3837_v47 = vpop.eup %3836 }
 0x853   : > { %v3839_v22 = vpop.eup %3838  ;;  %v2811_v23 = vadd.f32 1.0, %v3837_v47 }
 0x854   : > { %v2817_v24 = vadd.f32 1.0, %v3839_v22 }
 0x855   : > { %3844 = vrcp.f32 %v2811_v23 }
 0x856   : > { %3846 = vrcp.f32 %v2817_v24 }
 0x85a   : > { %v3841_v25 = vpop.eup %3840 }
 0x85b   : > { %v3843_v26 = vpop.eup %3842  ;;  %v2824_v28 = vadd.f32 1.0, %v3841_v25 }
 0x85d   : > { %3848 = vrcp.f32 %v2824_v28 }
 0x85f   : > { %v3845_v27 = vpop.eup %3844 }
 0x860   : > { %v3847_v29 = vpop.eup %3846  ;;  %v2828_v30 = vmul.f32 %v3845_v27, %v3843_v26 }
 0x861   : > { %v2827_v33 = vmul.f32 %v4124_v38, %v3847_v29 }
 0x863   : > { %v2829_v38 = vadd.f32 %v2828_v30, %v2827_v33  }
 0x865   : > { %3850 = vtanh.f32 %v2829_v38 }
 0x867   : > { %v3849_v34 = vpop.eup %3848 }
 0x86c   :  { %2509 = sbr.rel (!%p2507_p3) target bundleno = 1895 (0x767), region = 216 }
 0x86f   : > { %v3851_v35 = vpop.eup %3850 }
 0x870   : > { %v2831_v41 = vmul.f32 %v3851_v35, %v3849_v34  }
 0x872   : > { %2834 = vst.msk [vmem:[%s2832_s9] sm:$0x1] %vm828_vm4, %v2831_v41  ;;  %v3651_v41 = vpack.c.bf16 (%p2507_p3), %v2837_v37, %v2836_v36 }
 0x874   :  { %3652 = vmatpush3.bf16.msra.mxu0 %v3651_v41 }
 0x875   :  { %3653 = vmatprep.subr.bf16.mxu0 %v4145_v0 }
 0x878   :  { %3655 = vmatpush3.bf16.msra.mxu0 %v3654_v50 }
 0x879   :  { %v2835_v55 = vld [vmem:[#allocation21] sm:$0xff] }
 0x87b   :  { %3516 = vmatmul.mubr.msk.f32.vlgmr.msra.gmra.mrb[0].mxu0 %vm252_vm2, %v2835_v55 }
 0x94e   :  { %v2909_v48 = vpop.f32.mrb[0].mxu0 }
 0x94f   :  { %2913 = vst.msk [vmem:[#allocation34] sm:$0xff] %vm178_vm1, %v2909_v48  ;;  %v3517_v1 = vpop.f32.mrb[1].mxu0 }
 0x950   :  { %4017 = shalt.err (!%p4014_p8)
}
 0x951   :  { %s4018_s10 = scalar_lea.hbm %s4931_s14, 128 }
 0x952   :  { %p4019_p9 = scmp.ne.s32.totalorder %s4931_s14, %s4018_s10  ;;  %p4022_p10 = scmp.lt.u32.totalorder %s4018_s10, %s4931_s14 }
 0x954   :  { %p4024_p11 = pnand %p4022_p10, %p4019_p9 }
 0x956   :  { %4027 = shalt.err (!%p4024_p11)
}
 0x957   :  { %2923 = dma.vmem_to_hbm [thread:$0]  %s2921_s28, 128, %s4931_s14, [#allocation24]  }
 0x958   :  { %4084 = dma.done.wait [#allocation24], 128  }
 0x959   :  { %4085 = vsyncadd [#allocation24], 4294967168 }
 0x95a   :  { %2927 = vsyncpa [#allocation23], 1 }
 0x95b   :  { %2928 = vsyncpa [#allocation26], 1 }
 0x95c   :  { %2929 = vsyncpa [#allocation29], 1 }
 0x95d   :  { %2930 = vsyncpa [#allocation32], 1 }
 0x95e   :  { %2931 = vsyncpa [#allocation24], 1 }

</bundles_post_ra>
